<compile_context>
chip_gen: v6e
topology: v6e:2x2x1
jax: 0.10.0
libtpu: 0.0.40
codegen_flags: <defaults>
</compile_context>

<pallas_src>
import jax
import jax.numpy as jnp
from jax import lax
from jax.experimental import pallas as pl
from jax.experimental.pallas import tpu as pltpu


_C1_PAD = 8        # conv1 input channels zero-padded to one full f32 sublane group
_MAX_LANES = 2048  # cap on b_tile*L: wide MXU N dim, VMEM-safe on v7x (64 MiB)


def _choose_tiling(batch, length):
    """Pick (b_tile, num_tiles): fold as many batch rows into lanes as fit the
    lane cap, while keeping >= 2 grid steps when the batch allows (v7x 2 TCs)."""
    per_tile = max(1, _MAX_LANES // length)
    b_tile = max(1, min(per_tile, pl.cdiv(batch, 2)))
    num_tiles = pl.cdiv(batch, b_tile)
    return b_tile, num_tiles


def _prep_conv_w(w):
    """(C_out, C_in, K) -> (C_out, K*C_in), rows ordered k*C_in + c (tap-major im2col)."""
    c_out, c_in, k = w.shape
    return jnp.transpose(w, (0, 2, 1)).reshape(c_out, k * c_in).astype(jnp.float32)


# ----------------------------------------------------------------------------
# Fused kernel: the whole CNN for one batch tile (activations never leave VMEM).
# Activations are laid out (C, n) with n = b_tile * L, i.e. batch folded into
# the lane axis as b_tile segments of L lanes each.
# ----------------------------------------------------------------------------
def _cnn_fused_kernel(x_ref, w1_ref, b1_ref, w2_ref, b2_ref, w3_ref, b3_ref,
                      w4_ref, b4_ref, lw_ref, lb_ref, mask_ref, pool_ref,
                      o_ref, col_ref):
    n = x_ref.shape[-1]

    # Precomputed 0/1 boundary masks (hoisted to the host): rows are lane
    # offsets -2, -1, +1, +2 relative to each length-L batch segment.
    masks = mask_ref[...]
    mask_of = {-2: masks[0:1], -1: masks[1:2], 1: masks[2:3], 2: masks[3:4]}

    def conv_relu(h, w_ref, b_ref, offsets, c_in):
        # 'same' 1-D conv as one im2col matmul + ReLU.  Each tap is the input
        # rolled by -offset lanes (XLU) times its precomputed mask (one vmul),
        # written straight into the persistent VMEM scratch slab at 8-aligned
        # row offsets; then a single (C_out, K*C_in) @ (K*C_in, n) MXU matmul.
        for k, d in enumerate(offsets):
            t = h if d == 0 else pltpu.roll(h, (-d) % n, 1) * mask_of[d]
            col_ref[pl.ds(k * c_in, c_in), :] = t
        acc = jnp.dot(w_ref[...], col_ref[pl.ds(0, len(offsets) * c_in), :],
                      preferred_element_type=jnp.float32)
        return jnp.maximum(acc + b_ref[...], 0.0)

    x = x_ref[0]                                                     # (8, n)
    h = conv_relu(x, w1_ref, b1_ref, (-2, -1, 0, 1, 2), _C1_PAD)     # (16, n)
    h = conv_relu(h, w2_ref, b2_ref, (-1, 0, 1), 16)                 # (32, n)

    # AvgPool1d(2), linear cost: lane-pair averages land on even lanes; odd
    # lanes carry junk that the later stride-2 taps and the global-pool matrix
    # never read.
    h = 0.5 * (h + pltpu.roll(h, n - 1, 1))

    h = conv_relu(h, w3_ref, b3_ref, (-2, 0, 2), 32)                 # (64, n)
    h = conv_relu(h, w4_ref, b4_ref, (-2, 0, 2), 64)                 # (64, n)

    # AdaptiveAvgPool1d(1): mean of each segment's even lanes via one constant
    # (n, b_tile) matmul, fused with the Linear(64, 2) head.
    pooled = jnp.dot(h, pool_ref[...], preferred_element_type=jnp.float32)
    # TODO(synk): Dropout(0.3) is the identity in eval/inference mode; no mask here.
    logits = jnp.dot(lw_ref[...], pooled,
                     preferred_element_type=jnp.float32) + lb_ref[...]   # (2, b_tile)
    o_ref[0] = logits


# ----------------------------------------------------------------------------
# Wrapper: layout folding + one pallas_call for the whole network.
# ----------------------------------------------------------------------------
def cnn_forward(params, x):
    """x: (B, 2, L) float32 NCL.  Returns logits (B, 2).  Eval-mode forward."""
    batch, c_in, length = x.shape
    if length % 2 != 0:
        # TODO(synk): PyTorch AvgPool1d(2) floors odd lengths; only even L supported.
        raise ValueError("cnn_forward requires an even input length")

    b_tile, num_tiles = _choose_tiling(batch, length)
    n_lanes = b_tile * length
    padded_batch = b_tile * num_tiles

    w1, b1 = params["conv1"]; w2, b2 = params["conv2"]
    w3, b3 = params["conv3"]; w4, b4 = params["conv4"]
    lw, lb = params["linear"]

    # One-time parameter prep (tiny, plain XLA; could be cached with the params).
    w1p = jnp.pad(w1.astype(jnp.float32), ((0, 0), (0, _C1_PAD - c_in), (0, 0)))
    w1f, w2f, w3f, w4f = (_prep_conv_w(w1p), _prep_conv_w(w2),
                          _prep_conv_w(w3), _prep_conv_w(w4))
    b1f, b2f, b3f, b4f = (b.reshape(-1, 1).astype(jnp.float32)
                          for b in (b1, b2, b3, b4))
    lwf = lw.astype(jnp.float32)                       # (2, 64)
    lbf = lb.reshape(-1, 1).astype(jnp.float32)        # (2, 1)

    # Grid-invariant constants, built once here (hoisted out of the kernel body).
    pos = jnp.arange(n_lanes, dtype=jnp.int32) % length
    def edge_mask(d):
        return ((pos + d >= 0) & (pos + d < length)).astype(jnp.float32)
    masks = jnp.stack([edge_mask(-2), edge_mask(-1), edge_mask(1), edge_mask(2)])
    lane = jnp.arange(n_lanes, dtype=jnp.int32)
    # Global-pool matrix: 1/(L/2) at the even lanes of each length-L segment.
    pool_mat = jnp.where(
        (lane[:, None] // length == jnp.arange(b_tile, dtype=jnp.int32)[None, :])
        & (lane[:, None] % 2 == 0),
        jnp.float32(2.0 / length), jnp.float32(0.0))              # (n_lanes, b_tile)

    # Fold batch into the lane axis: (num_tiles, 8, b_tile*L).
    xp = x.astype(jnp.float32)
    if padded_batch != batch:
        xp = jnp.pad(xp, ((0, padded_batch - batch), (0, 0), (0, 0)))
    xp = jnp.pad(xp, ((0, 0), (0, _C1_PAD - c_in), (0, 0)))
    xf = (xp.reshape(num_tiles, b_tile, _C1_PAD, length)
            .transpose(0, 2, 1, 3)
            .reshape(num_tiles, _C1_PAD, n_lanes))

    def rep(a):  # whole-array block, replicated across the grid (no re-DMA per step)
        nd = a.ndim
        return pl.BlockSpec(a.shape, lambda i, _nd=nd: (0,) * _nd)

    out = pl.pallas_call(
        _cnn_fused_kernel,
        out_shape=jax.ShapeDtypeStruct((num_tiles, 2, b_tile), jnp.float32),
        grid=(num_tiles,),
        in_specs=[
            pl.BlockSpec((1, _C1_PAD, n_lanes), lambda i: (i, 0, 0)),
            rep(w1f), rep(b1f), rep(w2f), rep(b2f),
            rep(w3f), rep(b3f), rep(w4f), rep(b4f),
            rep(lwf), rep(lbf), rep(masks), rep(pool_mat),
        ],
        out_specs=pl.BlockSpec((1, 2, b_tile), lambda i: (i, 0, 0)),
        scratch_shapes=[pltpu.VMEM((3 * 64, n_lanes), jnp.float32)],  # im2col slab
        compiler_params=pltpu.CompilerParams(
            dimension_semantics=("parallel",),          # batch tiles shard across TCs
            vmem_limit_bytes=32 * 1024 * 1024),
    )(xf, w1f, b1f, w2f, b2f, w3f, b3f, w4f, b4f, lwf, lbf, masks, pool_mat)

    logits = out.transpose(0, 2, 1).reshape(padded_batch, 2)
    return logits[:batch]


# ----------------------------------------------------------------------------
# Deterministic parameter init (PyTorch-style uniform(-1/sqrt(fan_in), +)).
# ----------------------------------------------------------------------------
def init_params(key):
    def conv_init(k, c_out, c_in, ks):
        k1, k2 = jax.random.split(k)
        bound = 1.0 / jnp.sqrt(c_in * ks)
        w = jax.random.uniform(k1, (c_out, c_in, ks), jnp.float32, -bound, bound)
        b = jax.random.uniform(k2, (c_out,), jnp.float32, -bound, bound)
        return w, b

    def linear_init(k, out_f, in_f):
        k1, k2 = jax.random.split(k)
        bound = 1.0 / jnp.sqrt(in_f)
        w = jax.random.uniform(k1, (out_f, in_f), jnp.float32, -bound, bound)
        b = jax.random.uniform(k2, (out_f,), jnp.float32, -bound, bound)
        return w, b

    keys = jax.random.split(key, 5)
    return {
        "conv1": conv_init(keys[0], 16, 2, 5),
        "conv2": conv_init(keys[1], 32, 16, 3),
        "conv3": conv_init(keys[2], 64, 32, 3),
        "conv4": conv_init(keys[3], 64, 64, 3),
        "linear": linear_init(keys[4], 2, 64),
    }


# ----------------------------------------------------------------------------
# Pure-JAX reference (eval-mode forward of the PyTorch module) for validation.
# ----------------------------------------------------------------------------
def _cnn_reference(params, x):
    def conv(h, w, b, pad):
        y = lax.conv_general_dilated(
            h, w.astype(jnp.float32), window_strides=(1,), padding=[(pad, pad)],
            dimension_numbers=("NCH", "OIH", "NCH"))
        return jax.nn.relu(y + b.astype(jnp.float32)[None, :, None])

    h = conv(x, *params["conv1"], 2)
    h = conv(h, *params["conv2"], 1)
    b_, c_, l_ = h.shape
    h = h.reshape(b_, c_, l_ // 2, 2).mean(-1)
    h = conv(h, *params["conv3"], 1)
    h = conv(h, *params["conv4"], 1)
    h = h.mean(-1)                                     # (B, 64)
    w, b = params["linear"]
    return h @ w.T.astype(jnp.float32) + b.astype(jnp.float32)[None, :]


if __name__ == "__main__":
    key = jax.random.PRNGKey(0)
    k_params, k_x1, k_x2 = jax.random.split(key, 3)
    params = init_params(k_params)

    fwd = jax.jit(cnn_forward)

    # Primary small config (B=2, C=2, L=16): two grid steps, no batch padding.
    x1 = jax.random.normal(k_x1, (2, 2, 16), jnp.float32)
    out1 = jax.block_until_ready(fwd(params, x1))
    assert out1.shape == (2, 2) and out1.dtype == jnp.float32
    ref1 = _cnn_reference(params, x1)
    assert jnp.allclose(out1, ref1, atol=1e-4, rtol=1e-4), (out1, ref1)

    # Second config exercising batch padding + multi-row tiles (B=5, L=32).
    x2 = jax.random.normal(k_x2, (5, 2, 32), jnp.float32)
    out2 = jax.block_until_ready(fwd(params, x2))
    assert out2.shape == (5, 2)
    ref2 = _cnn_reference(params, x2)
    assert jnp.allclose(out2, ref2, atol=1e-4, rtol=1e-4), (out2, ref2)

    print("KERNEL_OK")
</pallas_src>

<mosaic_0001>
module attributes {stable_mosaic.version = 11 : i64} {
  func.func @_cnn_fused_kernel(%arg0: i32, %arg1: memref<1x8x16xf32, #tpu.memory_space<vmem>>, %arg2: memref<16x40xf32, #tpu.memory_space<vmem>>, %arg3: memref<16x1xf32, #tpu.memory_space<vmem>>, %arg4: memref<32x48xf32, #tpu.memory_space<vmem>>, %arg5: memref<32x1xf32, #tpu.memory_space<vmem>>, %arg6: memref<64x96xf32, #tpu.memory_space<vmem>>, %arg7: memref<64x1xf32, #tpu.memory_space<vmem>>, %arg8: memref<64x192xf32, #tpu.memory_space<vmem>>, %arg9: memref<64x1xf32, #tpu.memory_space<vmem>>, %arg10: memref<2x64xf32, #tpu.memory_space<vmem>>, %arg11: memref<2x1xf32, #tpu.memory_space<vmem>>, %arg12: memref<4x16xf32, #tpu.memory_space<vmem>>, %arg13: memref<16x1xf32, #tpu.memory_space<vmem>>, %arg14: memref<1x2x1xf32, #tpu.memory_space<vmem>>, %arg15: memref<192x16xf32, #tpu.memory_space<vmem>>) attributes {dimension_semantics = [#tpu.dimension_semantics<parallel>], iteration_bounds = array<i64: 2>, scalar_prefetch = 0 : i64, scratch_operands = 1 : i64, tpu.core_type = #tpu.core_type<tc>, window_params = [{transform_indices = @transform_0, window_bounds = array<i64: 1, 8, 16>}, {pipeline_mode = #tpu.pipeline_mode<synchronous>, transform_indices = @transform_1, window_bounds = array<i64: 16, 40>}, {pipeline_mode = #tpu.pipeline_mode<synchronous>, transform_indices = @transform_2, window_bounds = array<i64: 16, 1>}, {pipeline_mode = #tpu.pipeline_mode<synchronous>, transform_indices = @transform_3, window_bounds = array<i64: 32, 48>}, {pipeline_mode = #tpu.pipeline_mode<synchronous>, transform_indices = @transform_4, window_bounds = array<i64: 32, 1>}, {pipeline_mode = #tpu.pipeline_mode<synchronous>, transform_indices = @transform_5, window_bounds = array<i64: 64, 96>}, {pipeline_mode = #tpu.pipeline_mode<synchronous>, transform_indices = @transform_6, window_bounds = array<i64: 64, 1>}, {pipeline_mode = #tpu.pipeline_mode<synchronous>, transform_indices = @transform_7, window_bounds = array<i64: 64, 192>}, {pipeline_mode = #tpu.pipeline_mode<synchronous>, transform_indices = @transform_8, window_bounds = array<i64: 64, 1>}, {pipeline_mode = #tpu.pipeline_mode<synchronous>, transform_indices = @transform_9, window_bounds = array<i64: 2, 64>}, {pipeline_mode = #tpu.pipeline_mode<synchronous>, transform_indices = @transform_10, window_bounds = array<i64: 2, 1>}, {pipeline_mode = #tpu.pipeline_mode<synchronous>, transform_indices = @transform_11, window_bounds = array<i64: 4, 16>}, {pipeline_mode = #tpu.pipeline_mode<synchronous>, transform_indices = @transform_12, window_bounds = array<i64: 16, 1>}, {transform_indices = @transform_13, window_bounds = array<i64: 1, 2, 1>}]} {
    %c0 = arith.constant 0 : index
    %c0_0 = arith.constant 0 : index
    %0 = vector.load %arg12[%c0, %c0_0] : memref<4x16xf32, #tpu.memory_space<vmem>>, vector<4x16xf32>
    %1 = vector.extract_strided_slice %0 {offsets = [0, 0], sizes = [1, 16], strides = [1, 1]} : vector<4x16xf32> to vector<1x16xf32>
    %2 = vector.extract_strided_slice %0 {offsets = [1, 0], sizes = [1, 16], strides = [1, 1]} : vector<4x16xf32> to vector<1x16xf32>
    %3 = vector.extract_strided_slice %0 {offsets = [2, 0], sizes = [1, 16], strides = [1, 1]} : vector<4x16xf32> to vector<1x16xf32>
    %4 = vector.extract_strided_slice %0 {offsets = [3, 0], sizes = [1, 16], strides = [1, 1]} : vector<4x16xf32> to vector<1x16xf32>
    %c0_1 = arith.constant 0 : index
    %c0_2 = arith.constant 0 : index
    %c0_3 = arith.constant 0 : index
    %5 = vector.load %arg1[%c0_1, %c0_2, %c0_3] : memref<1x8x16xf32, #tpu.memory_space<vmem>>, vector<1x8x16xf32>
    %6 = vector.shape_cast %5 : vector<1x8x16xf32> to vector<8x16xf32>
    %c2_i32 = arith.constant 2 : i32
    %7 = tpu.dynamic_rotate %6 by %c2_i32 dim 1 : vector<8x16xf32>, i32 -> vector<8x16xf32>
    %8 = vector.broadcast %1 : vector<1x16xf32> to vector<8x16xf32>
    %9 = arith.mulf %7, %8 : vector<8x16xf32>
    %c0_4 = arith.constant 0 : index
    %c0_5 = arith.constant 0 : index
    %10 = vector.load %arg15[%c0_4, %c0_5] : memref<192x16xf32, #tpu.memory_space<vmem>>, vector<8x16xf32>
    tpu.vector_store %arg15[%c0_4, %c0_5], %9 {strides = array<i32>} : memref<192x16xf32, #tpu.memory_space<vmem>>, vector<8x16xf32>,
    %c1_i32 = arith.constant 1 : i32
    %11 = tpu.dynamic_rotate %6 by %c1_i32 dim 1 : vector<8x16xf32>, i32 -> vector<8x16xf32>
    %12 = vector.broadcast %2 : vector<1x16xf32> to vector<8x16xf32>
    %13 = arith.mulf %11, %12 : vector<8x16xf32>
    %c8 = arith.constant 8 : index
    %c0_6 = arith.constant 0 : index
    %14 = vector.load %arg15[%c8, %c0_6] : memref<192x16xf32, #tpu.memory_space<vmem>>, vector<8x16xf32>
    tpu.vector_store %arg15[%c8, %c0_6], %13 {strides = array<i32>} : memref<192x16xf32, #tpu.memory_space<vmem>>, vector<8x16xf32>,
    %c16 = arith.constant 16 : index
    %c0_7 = arith.constant 0 : index
    %15 = vector.load %arg15[%c16, %c0_7] : memref<192x16xf32, #tpu.memory_space<vmem>>, vector<8x16xf32>
    tpu.vector_store %arg15[%c16, %c0_7], %6 {strides = array<i32>} : memref<192x16xf32, #tpu.memory_space<vmem>>, vector<8x16xf32>,
    %c15_i32 = arith.constant 15 : i32
    %16 = tpu.dynamic_rotate %6 by %c15_i32 dim 1 : vector<8x16xf32>, i32 -> vector<8x16xf32>
    %17 = vector.broadcast %3 : vector<1x16xf32> to vector<8x16xf32>
    %18 = arith.mulf %16, %17 : vector<8x16xf32>
    %c24 = arith.constant 24 : index
    %c0_8 = arith.constant 0 : index
    %19 = vector.load %arg15[%c24, %c0_8] : memref<192x16xf32, #tpu.memory_space<vmem>>, vector<8x16xf32>
    tpu.vector_store %arg15[%c24, %c0_8], %18 {strides = array<i32>} : memref<192x16xf32, #tpu.memory_space<vmem>>, vector<8x16xf32>,
    %c14_i32 = arith.constant 14 : i32
    %20 = tpu.dynamic_rotate %6 by %c14_i32 dim 1 : vector<8x16xf32>, i32 -> vector<8x16xf32>
    %21 = vector.broadcast %4 : vector<1x16xf32> to vector<8x16xf32>
    %22 = arith.mulf %20, %21 : vector<8x16xf32>
    %c32 = arith.constant 32 : index
    %c0_9 = arith.constant 0 : index
    %23 = vector.load %arg15[%c32, %c0_9] : memref<192x16xf32, #tpu.memory_space<vmem>>, vector<8x16xf32>
    tpu.vector_store %arg15[%c32, %c0_9], %22 {strides = array<i32>} : memref<192x16xf32, #tpu.memory_space<vmem>>, vector<8x16xf32>,
    %c0_10 = arith.constant 0 : index
    %c0_11 = arith.constant 0 : index
    %24 = vector.load %arg2[%c0_10, %c0_11] : memref<16x40xf32, #tpu.memory_space<vmem>>, vector<16x40xf32>
    %c0_12 = arith.constant 0 : index
    %c0_13 = arith.constant 0 : index
    %25 = vector.load %arg15[%c0_12, %c0_13] : memref<192x16xf32, #tpu.memory_space<vmem>>, vector<40x16xf32>
    %cst = arith.constant dense<0.000000e+00> : vector<16x16xf32>
    %26 = tpu.matmul %24, %25, %cst {dimension_numbers = #tpu.dot_dimension_numbers<[1], [0], [0], [1], [0, 0, 1, 1], [], []>} : vector<16x40xf32>, vector<40x16xf32>, vector<16x16xf32> -> vector<16x16xf32>
    %c0_14 = arith.constant 0 : index
    %c0_15 = arith.constant 0 : index
    %27 = vector.load %arg3[%c0_14, %c0_15] : memref<16x1xf32, #tpu.memory_space<vmem>>, vector<16x1xf32>
    %28 = vector.broadcast %27 : vector<16x1xf32> to vector<16x16xf32>
    %29 = arith.addf %26, %28 : vector<16x16xf32>
    %cst_16 = arith.constant 0.000000e+00 : f32
    %30 = vector.broadcast %cst_16 : f32 to vector<16x16xf32>
    %31 = arith.maximumf %29, %30 : vector<16x16xf32>
    %c1_i32_17 = arith.constant 1 : i32
    %32 = tpu.dynamic_rotate %31 by %c1_i32_17 dim 1 : vector<16x16xf32>, i32 -> vector<16x16xf32>
    %33 = vector.broadcast %2 : vector<1x16xf32> to vector<16x16xf32>
    %34 = arith.mulf %32, %33 : vector<16x16xf32>
    %c0_18 = arith.constant 0 : index
    %c0_19 = arith.constant 0 : index
    %35 = vector.load %arg15[%c0_18, %c0_19] : memref<192x16xf32, #tpu.memory_space<vmem>>, vector<16x16xf32>
    tpu.vector_store %arg15[%c0_18, %c0_19], %34 {strides = array<i32>} : memref<192x16xf32, #tpu.memory_space<vmem>>, vector<16x16xf32>,
    %c16_20 = arith.constant 16 : index
    %c0_21 = arith.constant 0 : index
    %36 = vector.load %arg15[%c16_20, %c0_21] : memref<192x16xf32, #tpu.memory_space<vmem>>, vector<16x16xf32>
    tpu.vector_store %arg15[%c16_20, %c0_21], %31 {strides = array<i32>} : memref<192x16xf32, #tpu.memory_space<vmem>>, vector<16x16xf32>,
    %c15_i32_22 = arith.constant 15 : i32
    %37 = tpu.dynamic_rotate %31 by %c15_i32_22 dim 1 : vector<16x16xf32>, i32 -> vector<16x16xf32>
    %38 = vector.broadcast %3 : vector<1x16xf32> to vector<16x16xf32>
    %39 = arith.mulf %37, %38 : vector<16x16xf32>
    %c32_23 = arith.constant 32 : index
    %c0_24 = arith.constant 0 : index
    %40 = vector.load %arg15[%c32_23, %c0_24] : memref<192x16xf32, #tpu.memory_space<vmem>>, vector<16x16xf32>
    tpu.vector_store %arg15[%c32_23, %c0_24], %39 {strides = array<i32>} : memref<192x16xf32, #tpu.memory_space<vmem>>, vector<16x16xf32>,
    %c0_25 = arith.constant 0 : index
    %c0_26 = arith.constant 0 : index
    %41 = vector.load %arg4[%c0_25, %c0_26] : memref<32x48xf32, #tpu.memory_space<vmem>>, vector<32x48xf32>
    %c0_27 = arith.constant 0 : index
    %c0_28 = arith.constant 0 : index
    %42 = vector.load %arg15[%c0_27, %c0_28] : memref<192x16xf32, #tpu.memory_space<vmem>>, vector<48x16xf32>
    %cst_29 = arith.constant dense<0.000000e+00> : vector<32x16xf32>
    %43 = tpu.matmul %41, %42, %cst_29 {dimension_numbers = #tpu.dot_dimension_numbers<[1], [0], [0], [1], [0, 0, 1, 1], [], []>} : vector<32x48xf32>, vector<48x16xf32>, vector<32x16xf32> -> vector<32x16xf32>
    %c0_30 = arith.constant 0 : index
    %c0_31 = arith.constant 0 : index
    %44 = vector.load %arg5[%c0_30, %c0_31] : memref<32x1xf32, #tpu.memory_space<vmem>>, vector<32x1xf32>
    %45 = vector.broadcast %44 : vector<32x1xf32> to vector<32x16xf32>
    %46 = arith.addf %43, %45 : vector<32x16xf32>
    %cst_32 = arith.constant 0.000000e+00 : f32
    %47 = vector.broadcast %cst_32 : f32 to vector<32x16xf32>
    %48 = arith.maximumf %46, %47 : vector<32x16xf32>
    %c15_i32_33 = arith.constant 15 : i32
    %49 = tpu.dynamic_rotate %48 by %c15_i32_33 dim 1 : vector<32x16xf32>, i32 -> vector<32x16xf32>
    %50 = arith.addf %48, %49 : vector<32x16xf32>
    %cst_34 = arith.constant 5.000000e-01 : f32
    %51 = vector.broadcast %cst_34 : f32 to vector<32x16xf32>
    %52 = arith.mulf %51, %50 : vector<32x16xf32>
    %c2_i32_35 = arith.constant 2 : i32
    %53 = tpu.dynamic_rotate %52 by %c2_i32_35 dim 1 : vector<32x16xf32>, i32 -> vector<32x16xf32>
    %54 = vector.broadcast %1 : vector<1x16xf32> to vector<32x16xf32>
    %55 = arith.mulf %53, %54 : vector<32x16xf32>
    %c0_36 = arith.constant 0 : index
    %c0_37 = arith.constant 0 : index
    %56 = vector.load %arg15[%c0_36, %c0_37] : memref<192x16xf32, #tpu.memory_space<vmem>>, vector<32x16xf32>
    tpu.vector_store %arg15[%c0_36, %c0_37], %55 {strides = array<i32>} : memref<192x16xf32, #tpu.memory_space<vmem>>, vector<32x16xf32>,
    %c32_38 = arith.constant 32 : index
    %c0_39 = arith.constant 0 : index
    %57 = vector.load %arg15[%c32_38, %c0_39] : memref<192x16xf32, #tpu.memory_space<vmem>>, vector<32x16xf32>
    tpu.vector_store %arg15[%c32_38, %c0_39], %52 {strides = array<i32>} : memref<192x16xf32, #tpu.memory_space<vmem>>, vector<32x16xf32>,
    %c14_i32_40 = arith.constant 14 : i32
    %58 = tpu.dynamic_rotate %52 by %c14_i32_40 dim 1 : vector<32x16xf32>, i32 -> vector<32x16xf32>
    %59 = vector.broadcast %4 : vector<1x16xf32> to vector<32x16xf32>
    %60 = arith.mulf %58, %59 : vector<32x16xf32>
    %c64 = arith.constant 64 : index
    %c0_41 = arith.constant 0 : index
    %61 = vector.load %arg15[%c64, %c0_41] : memref<192x16xf32, #tpu.memory_space<vmem>>, vector<32x16xf32>
    tpu.vector_store %arg15[%c64, %c0_41], %60 {strides = array<i32>} : memref<192x16xf32, #tpu.memory_space<vmem>>, vector<32x16xf32>,
    %c0_42 = arith.constant 0 : index
    %c0_43 = arith.constant 0 : index
    %62 = vector.load %arg6[%c0_42, %c0_43] : memref<64x96xf32, #tpu.memory_space<vmem>>, vector<64x96xf32>
    %c0_44 = arith.constant 0 : index
    %c0_45 = arith.constant 0 : index
    %63 = vector.load %arg15[%c0_44, %c0_45] : memref<192x16xf32, #tpu.memory_space<vmem>>, vector<96x16xf32>
    %cst_46 = arith.constant dense<0.000000e+00> : vector<64x16xf32>
    %64 = tpu.matmul %62, %63, %cst_46 {dimension_numbers = #tpu.dot_dimension_numbers<[1], [0], [0], [1], [0, 0, 1, 1], [], []>} : vector<64x96xf32>, vector<96x16xf32>, vector<64x16xf32> -> vector<64x16xf32>
    %c0_47 = arith.constant 0 : index
    %c0_48 = arith.constant 0 : index
    %65 = vector.load %arg7[%c0_47, %c0_48] : memref<64x1xf32, #tpu.memory_space<vmem>>, vector<64x1xf32>
    %66 = vector.broadcast %65 : vector<64x1xf32> to vector<64x16xf32>
    %67 = arith.addf %64, %66 : vector<64x16xf32>
    %cst_49 = arith.constant 0.000000e+00 : f32
    %68 = vector.broadcast %cst_49 : f32 to vector<64x16xf32>
    %69 = arith.maximumf %67, %68 : vector<64x16xf32>
    %c2_i32_50 = arith.constant 2 : i32
    %70 = tpu.dynamic_rotate %69 by %c2_i32_50 dim 1 : vector<64x16xf32>, i32 -> vector<64x16xf32>
    %71 = vector.broadcast %1 : vector<1x16xf32> to vector<64x16xf32>
    %72 = arith.mulf %70, %71 : vector<64x16xf32>
    %c0_51 = arith.constant 0 : index
    %c0_52 = arith.constant 0 : index
    %73 = vector.load %arg15[%c0_51, %c0_52] : memref<192x16xf32, #tpu.memory_space<vmem>>, vector<64x16xf32>
    tpu.vector_store %arg15[%c0_51, %c0_52], %72 {strides = array<i32>} : memref<192x16xf32, #tpu.memory_space<vmem>>, vector<64x16xf32>,
    %c64_53 = arith.constant 64 : index
    %c0_54 = arith.constant 0 : index
    %74 = vector.load %arg15[%c64_53, %c0_54] : memref<192x16xf32, #tpu.memory_space<vmem>>, vector<64x16xf32>
    tpu.vector_store %arg15[%c64_53, %c0_54], %69 {strides = array<i32>} : memref<192x16xf32, #tpu.memory_space<vmem>>, vector<64x16xf32>,
    %c14_i32_55 = arith.constant 14 : i32
    %75 = tpu.dynamic_rotate %69 by %c14_i32_55 dim 1 : vector<64x16xf32>, i32 -> vector<64x16xf32>
    %76 = vector.broadcast %4 : vector<1x16xf32> to vector<64x16xf32>
    %77 = arith.mulf %75, %76 : vector<64x16xf32>
    %c128 = arith.constant 128 : index
    %c0_56 = arith.constant 0 : index
    %78 = vector.load %arg15[%c128, %c0_56] : memref<192x16xf32, #tpu.memory_space<vmem>>, vector<64x16xf32>
    tpu.vector_store %arg15[%c128, %c0_56], %77 {strides = array<i32>} : memref<192x16xf32, #tpu.memory_space<vmem>>, vector<64x16xf32>,
    %c0_57 = arith.constant 0 : index
    %c0_58 = arith.constant 0 : index
    %79 = vector.load %arg8[%c0_57, %c0_58] : memref<64x192xf32, #tpu.memory_space<vmem>>, vector<64x192xf32>
    %c0_59 = arith.constant 0 : index
    %c0_60 = arith.constant 0 : index
    %80 = vector.load %arg15[%c0_59, %c0_60] : memref<192x16xf32, #tpu.memory_space<vmem>>, vector<192x16xf32>
    %cst_61 = arith.constant dense<0.000000e+00> : vector<64x16xf32>
    %81 = tpu.matmul %79, %80, %cst_61 {dimension_numbers = #tpu.dot_dimension_numbers<[1], [0], [0], [1], [0, 0, 1, 1], [], []>} : vector<64x192xf32>, vector<192x16xf32>, vector<64x16xf32> -> vector<64x16xf32>
    %c0_62 = arith.constant 0 : index
    %c0_63 = arith.constant 0 : index
    %82 = vector.load %arg9[%c0_62, %c0_63] : memref<64x1xf32, #tpu.memory_space<vmem>>, vector<64x1xf32>
    %83 = vector.broadcast %82 : vector<64x1xf32> to vector<64x16xf32>
    %84 = arith.addf %81, %83 : vector<64x16xf32>
    %cst_64 = arith.constant 0.000000e+00 : f32
    %85 = vector.broadcast %cst_64 : f32 to vector<64x16xf32>
    %86 = arith.maximumf %84, %85 : vector<64x16xf32>
    %c0_65 = arith.constant 0 : index
    %c0_66 = arith.constant 0 : index
    %87 = vector.load %arg13[%c0_65, %c0_66] : memref<16x1xf32, #tpu.memory_space<vmem>>, vector<16x1xf32>
    %cst_67 = arith.constant dense<0.000000e+00> : vector<64x1xf32>
    %88 = tpu.matmul %86, %87, %cst_67 {dimension_numbers = #tpu.dot_dimension_numbers<[1], [0], [0], [1], [0, 0, 1, 1], [], []>} : vector<64x16xf32>, vector<16x1xf32>, vector<64x1xf32> -> vector<64x1xf32>
    %c0_68 = arith.constant 0 : index
    %c0_69 = arith.constant 0 : index
    %89 = vector.load %arg10[%c0_68, %c0_69] : memref<2x64xf32, #tpu.memory_space<vmem>>, vector<2x64xf32>
    %cst_70 = arith.constant dense<0.000000e+00> : vector<2x1xf32>
    %90 = tpu.matmul %89, %88, %cst_70 {dimension_numbers = #tpu.dot_dimension_numbers<[1], [0], [0], [1], [0, 0, 1, 1], [], []>} : vector<2x64xf32>, vector<64x1xf32>, vector<2x1xf32> -> vector<2x1xf32>
    %c0_71 = arith.constant 0 : index
    %c0_72 = arith.constant 0 : index
    %91 = vector.load %arg11[%c0_71, %c0_72] : memref<2x1xf32, #tpu.memory_space<vmem>>, vector<2x1xf32>
    %92 = arith.addf %90, %91 : vector<2x1xf32>
    %c0_73 = arith.constant 0 : index
    %c0_74 = arith.constant 0 : index
    %c0_75 = arith.constant 0 : index
    %93 = vector.load %arg14[%c0_73, %c0_74, %c0_75] : memref<1x2x1xf32, #tpu.memory_space<vmem>>, vector<1x2x1xf32>
    %94 = vector.shape_cast %93 : vector<1x2x1xf32> to vector<2x1xf32>
    %95 = vector.shape_cast %92 : vector<2x1xf32> to vector<1x2x1xf32>
    tpu.vector_store %arg14[%c0_73, %c0_74, %c0_75], %95 {strides = array<i32>} : memref<1x2x1xf32, #tpu.memory_space<vmem>>, vector<1x2x1xf32>,
    return
  }
  func.func @transform_0(%arg0: i32) -> (i32, i32, i32) {
    %c0_i32 = arith.constant 0 : i32
    %c0_i32_0 = arith.constant 0 : i32
    %c0_i32_1 = arith.constant 0 : i32
    return %arg0, %c0_i32, %c0_i32_0 : i32, i32, i32
  }
  func.func @transform_1(%arg0: i32) -> (i32, i32) {
    %c0_i32 = arith.constant 0 : i32
    %c0_i32_0 = arith.constant 0 : i32
    %c0_i32_1 = arith.constant 0 : i32
    return %c0_i32, %c0_i32_0 : i32, i32
  }
  func.func @transform_2(%arg0: i32) -> (i32, i32) {
    %c0_i32 = arith.constant 0 : i32
    %c0_i32_0 = arith.constant 0 : i32
    %c0_i32_1 = arith.constant 0 : i32
    return %c0_i32, %c0_i32_0 : i32, i32
  }
  func.func @transform_3(%arg0: i32) -> (i32, i32) {
    %c0_i32 = arith.constant 0 : i32
    %c0_i32_0 = arith.constant 0 : i32
    %c0_i32_1 = arith.constant 0 : i32
    return %c0_i32, %c0_i32_0 : i32, i32
  }
  func.func @transform_4(%arg0: i32) -> (i32, i32) {
    %c0_i32 = arith.constant 0 : i32
    %c0_i32_0 = arith.constant 0 : i32
    %c0_i32_1 = arith.constant 0 : i32
    return %c0_i32, %c0_i32_0 : i32, i32
  }
  func.func @transform_5(%arg0: i32) -> (i32, i32) {
    %c0_i32 = arith.constant 0 : i32
    %c0_i32_0 = arith.constant 0 : i32
    %c0_i32_1 = arith.constant 0 : i32
    return %c0_i32, %c0_i32_0 : i32, i32
  }
  func.func @transform_6(%arg0: i32) -> (i32, i32) {
    %c0_i32 = arith.constant 0 : i32
    %c0_i32_0 = arith.constant 0 : i32
    %c0_i32_1 = arith.constant 0 : i32
    return %c0_i32, %c0_i32_0 : i32, i32
  }
  func.func @transform_7(%arg0: i32) -> (i32, i32) {
    %c0_i32 = arith.constant 0 : i32
    %c0_i32_0 = arith.constant 0 : i32
    %c0_i32_1 = arith.constant 0 : i32
    return %c0_i32, %c0_i32_0 : i32, i32
  }
  func.func @transform_8(%arg0: i32) -> (i32, i32) {
    %c0_i32 = arith.constant 0 : i32
    %c0_i32_0 = arith.constant 0 : i32
    %c0_i32_1 = arith.constant 0 : i32
    return %c0_i32, %c0_i32_0 : i32, i32
  }
  func.func @transform_9(%arg0: i32) -> (i32, i32) {
    %c0_i32 = arith.constant 0 : i32
    %c0_i32_0 = arith.constant 0 : i32
    %c0_i32_1 = arith.constant 0 : i32
    return %c0_i32, %c0_i32_0 : i32, i32
  }
  func.func @transform_10(%arg0: i32) -> (i32, i32) {
    %c0_i32 = arith.constant 0 : i32
    %c0_i32_0 = arith.constant 0 : i32
    %c0_i32_1 = arith.constant 0 : i32
    return %c0_i32, %c0_i32_0 : i32, i32
  }
  func.func @transform_11(%arg0: i32) -> (i32, i32) {
    %c0_i32 = arith.constant 0 : i32
    %c0_i32_0 = arith.constant 0 : i32
    %c0_i32_1 = arith.constant 0 : i32
    return %c0_i32, %c0_i32_0 : i32, i32
  }
  func.func @transform_12(%arg0: i32) -> (i32, i32) {
    %c0_i32 = arith.constant 0 : i32
    %c0_i32_0 = arith.constant 0 : i32
    %c0_i32_1 = arith.constant 0 : i32
    return %c0_i32, %c0_i32_0 : i32, i32
  }
  func.func @transform_13(%arg0: i32) -> (i32, i32, i32) {
    %c0_i32 = arith.constant 0 : i32
    %c0_i32_0 = arith.constant 0 : i32
    %c0_i32_1 = arith.constant 0 : i32
    return %arg0, %c0_i32, %c0_i32_0 : i32, i32, i32
  }
}

</mosaic_0001>

<bundles_post_ra>
// kernel: cnn_forward.1
= control target key start
LH: loop header
LB: loop body
LE: loop exit
PB: predicated region body
PF: predicated region fallthrough
CT: control target
= control target key end

     0   :  { %s2059_s25 = smov 0   ;;  %s2562_s0 = inlined_call_operand.vmem [shape: f32[2,8,16], index: 0, kind: input, shape index: {}]   ;;  %s2563_s1 = inlined_call_operand.vmem [shape: f32[16,40], index: 1, kind: input, shape index: {}]   ;;  %s2564_s2 = inlined_call_operand.vmem [shape: f32[16,1], index: 2, kind: input, shape index: {}]   ;;  %s2565_s3 = inlined_call_operand.vmem [shape: f32[32,48], index: 3, kind: input, shape index: {}]   ;;  %s2566_s4 = inlined_call_operand.vmem [shape: f32[32,1], index: 4, kind: input, shape index: {}]   ;;  %s2567_s5 = inlined_call_operand.vmem [shape: f32[64,96], index: 5, kind: input, shape index: {}]   ;;  %s2568_s6 = inlined_call_operand.vmem [shape: f32[64,1], index: 6, kind: input, shape index: {}]   ;;  %s2569_s7 = inlined_call_operand.vmem [shape: f32[64,192], index: 7, kind: input, shape index: {}]   ;;  %s2570_s8 = inlined_call_operand.vmem [shape: f32[64,1], index: 8, kind: input, shape index: {}]   ;;  %s2571_s9 = inlined_call_operand.vmem [shape: f32[2,64], index: 9, kind: input, shape index: {}]   ;;  %s2572_s10 = inlined_call_operand.vmem [shape: f32[2,1], index: 10, kind: input, shape index: {}]   ;;  %s2573_s11 = inlined_call_operand.vmem [shape: f32[4,16], index: 11, kind: input, shape index: {}]   ;;  %s2574_s12 = inlined_call_operand.vmem [shape: f32[16,1], index: 12, kind: input, shape index: {}]   ;;  %s2575_s13 = inlined_call_operand.vmem [shape: f32[2,2,1], index: 13, kind: output, shape index: {}]  }
   0x1 LB: > { %s1749_s26 = sadd.s32 4294967295, %s1975_s25   ;;  %p1753_p0 = scmp.ge.s32.totalorder %s1975_s25, 1  ;;  %s1975_s25 = sphi %s2059_s25, %s23_s25  }
   0x2   : > { %p386_p1 = scmp.lt.s32.totalorder %s1975_s25, 3 }
   0x4   : > { %p387_p2 = pnand %p1753_p0, %p386_p1 }
   0x5   : > { %p428_p3 = scmp.lt.s32.totalorder (!%p387_p2), %s1749_s26, 1  ;;  %s1977_s16 = smov (!%p387_p2), 16  }
   0x6   : > { %390 = sbr.rel (%p387_p2) target bundleno = 3107 (0xc23), region = 72  ;;  %s1978_s17 = smov (!%p387_p2), 2  }
   0x7   : > { %s1979_s18 = smov (!%p387_p2), 1   ;;  %s1980_s19 = smov (!%p387_p2), 14  }
   0x8   : > { %s1981_s20 = smov (!%p387_p2), 15   ;;  %s1982_s21 = smov (!%p387_p2), 126  }
   0x9   : > { %s1983_s22 = smov (!%p387_p2), 127   ;;  %s1984_s27 = smov (!%p387_p2), 114  }
   0xa   : > { %s1985_s28 = smov (!%p387_p2), 113  }
   0xb   : > { %v445_v0 = vlaneseq  ;;  %s2577_s26 = smov (!%p428_p3, %s1749_s26), 1  ;;  %v436_v2 = vld [vmem:[%s2573_s11] sm:$0xf]  ;;  %vm458_vm0 = vcmask 130048   ;;  %vm438_vm1 = vcmask 1047680   ;;  %vm522_vm2 = vcmask 326656  }
   0xc   : > { %s1754_s29 = sshll.u32 %s2577_s26, 3  ;;  %v503_v24 = vld [vmem:[%s2563_s1] sm:$0xff]  ;;  %v511_v25 = vld [vmem:[%s2564_s2 + $0x8] sm:$0xff]  ;;  %v1986_v27 = vmov 0   ;;  %v657_v58 = vld [vmem:[%s2566_s4 + $0x18] sm:$0xff]  ;;  %vm678_vm3 = vcmask 392192  }
   0xd   : > { %v446_v1 = vshrl.u32 %v445_v0, 7  ;;  %s431_s15 = scalar_lea.vmem %s2562_s0, %s1754_s29  ;;  %1855 = vmatprep.mubr.msk.f32.mxu0 %vm522_vm2, %v503_v24  ;;  %v510_v26 = vld [vmem:[%s2564_s2] sm:$0xff]  ;;  %1967 = vset.pattern.permute.xlu0 %v1986_v27  ;;  %v504_v37 = vld [vmem:[%s2563_s1 + $0x8] sm:$0xff]  ;;  %v656_v60 = vld [vmem:[%s2566_s4 + $0x10] sm:$0xff]  ;;  %vm972_vm4 = vcmask 785408   ;;  %vm1350_vm5 = vcmask 523264  }
   0xe   : > { %v437_v6 = vld [vmem:[%s431_s15] sm:$0xff]  ;;  %1968 = vset.pattern.permute.xlu1 %v1986_v27  ;;  %v655_v61 = vld [vmem:[%s2566_s4 + $0x8] sm:$0xff]  ;;  %vm1988_vm6 = vmmov 0   ;;  %s1755_s15 = sshll.u32 %s2577_s26, 1  ;;  %vm1694_vm7 = vcmask 1024  }
   0xf   : > { %v491_v3 = vsub.s32 3, %v446_v1  ;;  %v477_v4 = vsub.s32 2, %v446_v1  ;;  %v462_v5 = vsub.s32 1, %v446_v1  ;;  %439 = vrot.lane.b32.xlu0 %v437_v6, %s1977_s16  ;;  %474 = vst.msk [vmem:[#allocation2 + $0x10] sm:$0xff] %vm458_vm0, %v437_v6  ;;  %v447_v10 = vsub.s32 0, %v446_v1  ;;  %v644_v59 = vld [vmem:[%s2565_s3] sm:$0xff] }
  0x10   : > { %v654_v62 = vld [vmem:[%s2566_s4] sm:$0xff] }
  0x11   : > { %v492_v7 = vrot.slane %v436_v2, %v491_v3  ;;  %v463_v8 = vrot.slane %v436_v2, %v462_v5  ;;  %v478_v9 = vrot.slane %v436_v2, %v477_v4  ;;  %v448_v11 = vrot.slane %v436_v2, %v447_v10  ;;  %v646_v10 = vld [vmem:[%s2565_s3 + $0x10] sm:$0xff] }
  0x13   : > { %494 = vrot.lane.b32.xlu1 %v492_v7, %s1978_s17 }
  0x16   : > { %v507_v34 = vld [vmem:[#allocation2 + $0x10] sm:$0xff] }
  0x17   : > { %480 = vrot.lane.b32.xlu1 %v478_v9, %s1979_s18  ;;  %v645_v9 = vld [vmem:[%s2565_s3 + $0x8] sm:$0xff] }
  0x1b   : > { %450 = vrot.lane.b32.xlu1 %v448_v11, %s1980_s19  ;;  %v647_v11 = vld [vmem:[%s2565_s3 + $0x18] sm:$0xff]  ;;  %s435_s19 = scalar_lea.vmem %s2575_s13, %s1755_s15 }
  0x81   : > { %v440_v12 = vpop.permute.xlu0 %439 }
  0x82   : > { %v441_v13 = vsel %vm438_vm1, %v440_v12, %v437_v6 }
  0x83   : > { %442 = vrot.lane.b32.xlu0 %v441_v13, %s1977_s16 }
  0x85   : > { %v2080_v14 = vpop.permute.xlu1 %494 }
  0x87   : > { %465 = vrot.lane.b32.xlu0 %v463_v8, %s1981_s20 }
  0x89   : > { %v2082_v15 = vpop.permute.xlu1 %480 }
  0x8d   : > { %v2087_v20 = vpop.permute.xlu1 %450 }
  0xf5   : > { %v443_v16 = vpop.permute.xlu0 %442 }
  0xf6   : > { %v444_v17 = vsel %vm438_vm1, %v443_v16, %v437_v6 }
  0xf7   : > { %v497_v18 = vmul.f32 %v2080_v14, %v444_v17  ;;  %v483_v19 = vmul.f32 %v2082_v15, %v444_v17  ;;  %v453_v23 = vmul.f32 %v2087_v20, %v444_v17 }
  0xf9   : > { %499 = vrot.lane.b32.xlu0 %v497_v18, %s1982_s21  ;;  %485 = vrot.lane.b32.xlu1 %v483_v19, %s1983_s22  ;;  %v2091_v21 = vpop.permute.xlu0 %465 }
  0xfa   : > { %v468_v22 = vmul.f32 %v2091_v21, %v444_v17 }
  0xfd   : > { %455 = vrot.lane.b32.xlu1 %v453_v23, %s1984_s27  ;;  %470 = vrot.lane.b32.xlu0 %v468_v22, %s1985_s28 }
 0x101   : > { %519 = vperm.xlu0 %1967, %v511_v25   ;;  %514 = vperm.xlu1 %1968, %v510_v26  }
 0x16b   : > { %v486_v28 = vpop.permute.xlu1 %485  ;;  %v500_v29 = vpop.permute.xlu0 %499 }
 0x16c   : > { %488 = vst.msk [vmem:[#allocation2 + $0x18] sm:$0xff] %vm458_vm0, %v486_v28  ;;  %502 = vst.msk [vmem:[#allocation2 + $0x20] sm:$0xff] %vm458_vm0, %v500_v29 }
 0x16f   : > { %v456_v30 = vpop.permute.xlu1 %455  ;;  %v471_v31 = vpop.permute.xlu0 %470 }
 0x170   : > { %459 = vst.msk [vmem:[#allocation2] sm:$0xff] %vm458_vm0, %v456_v30  ;;  %473 = vst.msk [vmem:[#allocation2 + $0x8] sm:$0xff] %vm458_vm0, %v471_v31 }
 0x173   : > { %v509_v32 = vld [vmem:[#allocation2 + $0x20] sm:$0xff]  ;;  %v508_v33 = vld [vmem:[#allocation2 + $0x18] sm:$0xff] }
 0x174   : > { %1845 = vmatprep.subr.mxu0 %v509_v32 }
 0x175   : > { %1846 = vmatpush3.msra.mxu0 %v509_v32 }
 0x176   : > { %1847 = vmatprep.subr.mxu0 %v508_v33 }
 0x177   : > { %1848 = vmatpush3.msra.mxu0 %v508_v33  ;;  %v506_v35 = vld [vmem:[#allocation2 + $0x8] sm:$0xff]  ;;  %v505_v36 = vld [vmem:[#allocation2] sm:$0xff] }
 0x178   : > { %1849 = vmatprep.subr.mxu0 %v507_v34 }
 0x179   : > { %1850 = vmatpush3.msra.mxu0 %v507_v34 }
 0x17a   : > { %1851 = vmatprep.subr.mxu0 %v506_v35 }
 0x17b   : > { %1852 = vmatpush3.msra.mxu0 %v506_v35 }
 0x17c   : > { %1853 = vmatprep.subr.mxu0 %v505_v36  ;;  %v520_v38 = vpop.permute.xlu0 %519  ;;  %v515_v40 = vpop.permute.xlu1 %514 }
 0x17d   : > { %1854 = vmatpush3.msra.mxu0 %v505_v36 }
 0x17e   : > { %1856 = vmatmul.mubr.msk.f32.vlgmr.msra.gmra.mxu0 %vm522_vm2, %v504_v37 }
 0x17f   : > { %1870 = vmatprep.mubr.msk.f32.mxu0 %vm678_vm3, %v644_v59 }
 0x23e   : > { %v1857_v39 = vpop.f32.mrf.mxu0 }
 0x23f   : > { %v601_v41 = vadd.f32 %v1857_v39, %v520_v38 }
 0x240   : > { %v595_v42 = vpop.f32.mrf.mxu0 }
 0x241   : > { %v605_v43 = vmax.f32 %v601_v41, 0.0  ;;  %v596_v44 = vadd.f32 %v595_v42, %v515_v40 }
 0x243   : > { %631 = vst.msk [vmem:[#allocation2 + $0x18] sm:$0xff] %vm458_vm0, %v605_v43  ;;  %v604_v45 = vmax.f32 %v596_v44, 0.0  ;;  %609 = vrot.lane.b32.xlu1 %v605_v43, %s1977_s16 }
 0x245   : > { %630 = vst.msk [vmem:[#allocation2 + $0x10] sm:$0xff] %vm458_vm0, %v604_v45  ;;  %606 = vrot.lane.b32.xlu0 %v604_v45, %s1977_s16 }
 0x24a   : > { %v651_v5 = vld [vmem:[#allocation2 + $0x18] sm:$0xff] }
 0x24c   : > { %v650_v6 = vld [vmem:[#allocation2 + $0x10] sm:$0xff] }
 0x2b5   : > { %v610_v46 = vpop.permute.xlu1 %609 }
 0x2b6   : > { %v611_v47 = vsel %vm438_vm1, %v610_v46, %v605_v43 }
 0x2b7   : > { %614 = vrot.lane.b32.xlu1 %v611_v47, %s1977_s16  ;;  %v607_v48 = vpop.permute.xlu0 %606 }
 0x2b8   : > { %v608_v49 = vsel %vm438_vm1, %v607_v48, %v604_v45 }
 0x2b9   : > { %612 = vrot.lane.b32.xlu0 %v608_v49, %s1977_s16 }
 0x329   : > { %v615_v50 = vpop.permute.xlu1 %614 }
 0x32a   : > { %v617_v51 = vsel %vm438_vm1, %v615_v50, %v605_v43 }
 0x32b   : > { %v633_v52 = vmul.f32 %v617_v51, %v2082_v15  ;;  %v613_v53 = vpop.permute.xlu0 %612  ;;  %v619_v56 = vmul.f32 %v617_v51, %v2091_v21 }
 0x32c   : > { %v616_v54 = vsel %vm438_vm1, %v613_v53, %v604_v45 }
 0x32d   : > { %v632_v55 = vmul.f32 %v616_v54, %v2082_v15  ;;  %638 = vrot.lane.b32.xlu1 %v633_v52, %s1983_s22  ;;  %v618_v57 = vmul.f32 %v616_v54, %v2091_v21 }
 0x32f   : > { %636 = vrot.lane.b32.xlu0 %v632_v55, %s1983_s22 }
 0x331   : > { %624 = vrot.lane.b32.xlu1 %v619_v56, %s1985_s28 }
 0x333   : > { %622 = vrot.lane.b32.xlu0 %v618_v57, %s1985_s28 }
 0x335   : > { %675 = vperm.xlu1 %1968, %v657_v58  }
 0x337   : > { %670 = vperm.xlu0 %1967, %v656_v60  }
 0x339   : > { %665 = vperm.xlu1 %1968, %v655_v61  }
 0x33b   : > { %660 = vperm.xlu0 %1967, %v654_v62  }
 0x39f   : > { %v639_v63 = vpop.permute.xlu1 %638 }
 0x3a0   : > { %643 = vst.msk [vmem:[#allocation2 + $0x28] sm:$0xff] %vm458_vm0, %v639_v63 }
 0x3a1   : > { %v637_v0 = vpop.permute.xlu0 %636 }
 0x3a2   : > { %642 = vst.msk [vmem:[#allocation2 + $0x20] sm:$0xff] %vm458_vm0, %v637_v0 }
 0x3a3   : > { %v625_v1 = vpop.permute.xlu1 %624 }
 0x3a4   : > { %629 = vst.msk [vmem:[#allocation2 + $0x8] sm:$0xff] %vm458_vm0, %v625_v1 }
 0x3a5   : > { %v623_v2 = vpop.permute.xlu0 %622 }
 0x3a6   : > { %628 = vst.msk [vmem:[#allocation2] sm:$0xff] %vm458_vm0, %v623_v2 }
 0x3a7   : > { %v653_v3 = vld [vmem:[#allocation2 + $0x28] sm:$0xff] }
 0x3a8   : > { %1858 = vmatprep.subr.mxu0 %v653_v3 }
 0x3a9   : > { %1859 = vmatpush3.msra.mxu0 %v653_v3  ;;  %v652_v4 = vld [vmem:[#allocation2 + $0x20] sm:$0xff] }
 0x3aa   : > { %1860 = vmatprep.subr.mxu0 %v652_v4 }
 0x3ab   : > { %1861 = vmatpush3.msra.mxu0 %v652_v4  ;;  %v649_v7 = vld [vmem:[#allocation2 + $0x8] sm:$0xff] }
 0x3ac   : > { %1862 = vmatprep.subr.mxu0 %v651_v5 }
 0x3ad   : > { %1863 = vmatpush3.msra.mxu0 %v651_v5  ;;  %v648_v8 = vld [vmem:[#allocation2] sm:$0xff] }
 0x3ae   : > { %1864 = vmatprep.subr.mxu0 %v650_v6 }
 0x3af   : > { %1865 = vmatpush3.msra.mxu0 %v650_v6 }
 0x3b0   : > { %1866 = vmatprep.subr.mxu0 %v649_v7  ;;  %v676_v12 = vpop.permute.xlu1 %675 }
 0x3b1   : > { %1867 = vmatpush3.msra.mxu0 %v649_v7 }
 0x3b2   : > { %1868 = vmatprep.subr.mxu0 %v648_v8  ;;  %v671_v15 = vpop.permute.xlu0 %670 }
 0x3b3   : > { %1869 = vmatpush3.msra.mxu0 %v648_v8 }
 0x3b4   : > { %1871 = vmatmul.mubr.msk.f32.vlgmr.msra.gmra.mxu0 %vm678_vm3, %v645_v9  ;;  %v666_v19 = vpop.permute.xlu1 %665 }
 0x3b5   : > { %1873 = vmatprep.mubr.msk.f32.mxu0 %vm678_vm3, %v646_v10 }
 0x3b6   : > { %v661_v25 = vpop.permute.xlu0 %660 }
 0x3b8   : > { %1874 = vmatmul.mubr.msk.f32.gmra.mxu0 %vm678_vm3, %v647_v11 }
 0x474   : > { %v1872_v13 = vpop.f32.mrf.mxu0 }
 0x475   : > { %v763_v22 = vadd.f32 %v1872_v13, %v666_v19  ;;  %v931_v19 = vld [vmem:[%s2568_s6 + $0x38] sm:$0xff] }
 0x476   : > { %v757_v16 = vpop.f32.mrf.mxu0 }
 0x477   : > { %v758_v26 = vadd.f32 %v757_v16, %v661_v25  ;;  %v777_v28 = vmax.f32 %v763_v22, 0.0  ;;  %v929_v22 = vld [vmem:[%s2568_s6 + $0x28] sm:$0xff]  ;;  %v927_v25 = vld [vmem:[%s2568_s6 + $0x18] sm:$0xff] }
 0x478   : > { %v1875_v17 = vpop.f32.mrf.mxu0 }
 0x479   : > { %v773_v18 = vadd.f32 %v1875_v17, %v676_v12  ;;  %v776_v29 = vmax.f32 %v758_v26, 0.0  ;;  %v926_v26 = vld [vmem:[%s2568_s6 + $0x10] sm:$0xff] }
 0x47a   : > { %v767_v21 = vpop.f32.mrf.mxu0 }
 0x47b   : > { %v779_v23 = vmax.f32 %v773_v18, 0.0  ;;  %v768_v24 = vadd.f32 %v767_v21, %v671_v15  ;;  %v930_v21 = vld [vmem:[%s2568_s6 + $0x30] sm:$0xff] }
 0x47d   : > { %v778_v27 = vmax.f32 %v768_v24, 0.0  ;;  %789 = vrot.lane.b32.xlu1 %v779_v23, %s1977_s16  ;;  %v928_v24 = vld [vmem:[%s2568_s6 + $0x20] sm:$0xff] }
 0x47f   : > { %786 = vrot.lane.b32.xlu0 %v778_v27, %s1977_s16 }
 0x481   : > { %783 = vrot.lane.b32.xlu1 %v777_v28, %s1977_s16 }
 0x483   : > { %780 = vrot.lane.b32.xlu0 %v776_v29, %s1977_s16 }
 0x4ef   : > { %v790_v30 = vpop.permute.xlu1 %789 }
 0x4f0   : > { %v791_v31 = vsel %vm438_vm1, %v790_v30, %v779_v23 }
 0x4f1   : > { %798 = vrot.lane.b32.xlu1 %v791_v31, %s1977_s16  ;;  %v787_v32 = vpop.permute.xlu0 %786 }
 0x4f2   : > { %v788_v33 = vsel %vm438_vm1, %v787_v32, %v778_v27 }
 0x4f3   : > { %v784_v34 = vpop.permute.xlu1 %783  ;;  %796 = vrot.lane.b32.xlu0 %v788_v33, %s1977_s16 }
 0x4f4   : > { %v785_v35 = vsel %vm438_vm1, %v784_v34, %v777_v28 }
 0x4f5   : > { %794 = vrot.lane.b32.xlu1 %v785_v35, %s1977_s16  ;;  %v781_v36 = vpop.permute.xlu0 %780 }
 0x4f6   : > { %v782_v37 = vsel %vm438_vm1, %v781_v36, %v776_v29 }
 0x4f7   : > { %792 = vrot.lane.b32.xlu0 %v782_v37, %s1977_s16 }
 0x563   : > { %v799_v38 = vpop.permute.xlu1 %798 }
 0x564   : > { %v803_v39 = vsel %vm438_vm1, %v799_v38, %v779_v23 }
 0x565   : > { %814 = vrot.lane.b32.xlu1 %v803_v39, %s1983_s22  ;;  %v797_v40 = vpop.permute.xlu0 %796 }
 0x566   : > { %v802_v41 = vsel %vm438_vm1, %v797_v40, %v778_v27 }
 0x567   : > { %v795_v42 = vpop.permute.xlu1 %794  ;;  %812 = vrot.lane.b32.xlu0 %v802_v41, %s1983_s22 }
 0x568   : > { %v801_v43 = vsel %vm438_vm1, %v795_v42, %v777_v28 }
 0x569   : > { %810 = vrot.lane.b32.xlu1 %v801_v43, %s1983_s22  ;;  %v793_v44 = vpop.permute.xlu0 %792 }
 0x56a   : > { %v800_v45 = vsel %vm438_vm1, %v793_v44, %v776_v29 }
 0x56b   : > { %808 = vrot.lane.b32.xlu0 %v800_v45, %s1983_s22 }
 0x5d7   : > { %v815_v46 = vpop.permute.xlu1 %814 }
 0x5d8   : > { %v823_v47 = vadd.f32 %v815_v46, %v779_v23  ;;  %v904_v23 = vld [vmem:[%s2567_s5] sm:$0xff] }
 0x5d9   : > { %v813_v48 = vpop.permute.xlu0 %812  ;;  %1900 = vmatprep.mubr.msk.f32.mxu0 %vm972_vm4, %v904_v23 }
 0x5da   : > { %v827_v49 = vmul.f32 0.5, %v823_v47  ;;  %v822_v50 = vadd.f32 %v813_v48, %v778_v27  ;;  %v925_v27 = vld [vmem:[%s2568_s6 + $0x8] sm:$0xff] }
 0x5db   : > { %v811_v51 = vpop.permute.xlu1 %810 }
 0x5dc   : > { %879 = vst.msk [vmem:[#allocation2 + $0x38] sm:$0xff] %vm458_vm0, %v827_v49  ;;  %v826_v52 = vmul.f32 0.5, %v822_v50  ;;  %v821_v53 = vadd.f32 %v811_v51, %v777_v28  ;;  %837 = vrot.lane.b32.xlu1 %v827_v49, %s1977_s16  ;;  %v924_v28 = vld [vmem:[%s2568_s6] sm:$0xff]  ;;  %v906_v50 = vld [vmem:[%s2567_s5 + $0x10] sm:$0xff]  ;;  %v907_v51 = vld [vmem:[%s2567_s5 + $0x18] sm:$0xff] }
 0x5dd   : > { %v809_v54 = vpop.permute.xlu0 %808 }
 0x5de   : > { %878 = vst.msk [vmem:[#allocation2 + $0x30] sm:$0xff] %vm458_vm0, %v826_v52  ;;  %v825_v55 = vmul.f32 0.5, %v821_v53  ;;  %v820_v56 = vadd.f32 %v809_v54, %v776_v29  ;;  %834 = vrot.lane.b32.xlu0 %v826_v52, %s1977_s16  ;;  %v909_v53 = vld [vmem:[%s2567_s5 + $0x28] sm:$0xff]  ;;  %v910_v54 = vld [vmem:[%s2567_s5 + $0x30] sm:$0xff] }
 0x5e0   : > { %877 = vst.msk [vmem:[#allocation2 + $0x28] sm:$0xff] %vm458_vm0, %v825_v55  ;;  %v824_v57 = vmul.f32 0.5, %v820_v56  ;;  %831 = vrot.lane.b32.xlu1 %v825_v55, %s1977_s16  ;;  %v1987_v56 = vmov 0.0  }
 0x5e1   : > { %1375 = vmatprep.subr.mxu1 %v1987_v56 }
 0x5e2   : > { %876 = vst.msk [vmem:[#allocation2 + $0x20] sm:$0xff] %vm458_vm0, %v824_v57  ;;  %828 = vrot.lane.b32.xlu0 %v824_v57, %s1977_s16 }
 0x5e3   : > { %v919_v41 = vld [vmem:[#allocation2 + $0x38] sm:$0xff] }
 0x5e5   : > { %v918_v42 = vld [vmem:[#allocation2 + $0x30] sm:$0xff] }
 0x5e7   : > { %v917_v43 = vld [vmem:[#allocation2 + $0x28] sm:$0xff] }
 0x5e9   : > { %v916_v44 = vld [vmem:[#allocation2 + $0x20] sm:$0xff] }
 0x64e   : > { %v838_v58 = vpop.permute.xlu1 %837 }
 0x64f   : > { %v839_v59 = vsel %vm438_vm1, %v838_v58, %v827_v49 }
 0x650   : > { %846 = vrot.lane.b32.xlu1 %v839_v59, %s1977_s16  ;;  %v835_v60 = vpop.permute.xlu0 %834 }
 0x651   : > { %v836_v61 = vsel %vm438_vm1, %v835_v60, %v826_v52 }
 0x652   : > { %v832_v62 = vpop.permute.xlu1 %831  ;;  %844 = vrot.lane.b32.xlu0 %v836_v61, %s1977_s16 }
 0x653   : > { %v833_v63 = vsel %vm438_vm1, %v832_v62, %v825_v55 }
 0x654   : > { %842 = vrot.lane.b32.xlu1 %v833_v63, %s1977_s16  ;;  %v829_v0 = vpop.permute.xlu0 %828 }
 0x655   : > { %v830_v1 = vsel %vm438_vm1, %v829_v0, %v824_v57 }
 0x656   : > { %840 = vrot.lane.b32.xlu0 %v830_v1, %s1977_s16 }
 0x6c2   : > { %v847_v2 = vpop.permute.xlu1 %846 }
 0x6c3   : > { %v851_v3 = vsel %vm438_vm1, %v847_v2, %v827_v49  ;;  %v905_v49 = vld [vmem:[%s2567_s5 + $0x8] sm:$0xff] }
 0x6c4   : > { %v883_v4 = vmul.f32 %v851_v3, %v2080_v14  ;;  %v845_v5 = vpop.permute.xlu0 %844  ;;  %v855_v15 = vmul.f32 %v851_v3, %v2087_v20 }
 0x6c5   : > { %v850_v6 = vsel %vm438_vm1, %v845_v5, %v826_v52  ;;  %v908_v52 = vld [vmem:[%s2567_s5 + $0x20] sm:$0xff] }
 0x6c6   : > { %v882_v7 = vmul.f32 %v850_v6, %v2080_v14  ;;  %894 = vrot.lane.b32.xlu1 %v883_v4, %s1982_s21  ;;  %v843_v8 = vpop.permute.xlu1 %842  ;;  %v854_v16 = vmul.f32 %v850_v6, %v2087_v20 }
 0x6c7   : > { %v849_v9 = vsel %vm438_vm1, %v843_v8, %v825_v55  ;;  %v911_v55 = vld [vmem:[%s2567_s5 + $0x38] sm:$0xff] }
 0x6c8   : > { %v881_v10 = vmul.f32 %v849_v9, %v2080_v14  ;;  %892 = vrot.lane.b32.xlu0 %v882_v7, %s1982_s21  ;;  %v841_v11 = vpop.permute.xlu0 %840  ;;  %v853_v17 = vmul.f32 %v849_v9, %v2087_v20 }
 0x6c9   : > { %v848_v12 = vsel %vm438_vm1, %v841_v11, %v824_v57 }
 0x6ca   : > { %v880_v13 = vmul.f32 %v848_v12, %v2080_v14  ;;  %890 = vrot.lane.b32.xlu1 %v881_v10, %s1982_s21  ;;  %v852_v18 = vmul.f32 %v848_v12, %v2087_v20 }
 0x6cc   : > { %888 = vrot.lane.b32.xlu0 %v880_v13, %s1982_s21 }
 0x6ce   : > { %866 = vrot.lane.b32.xlu1 %v855_v15, %s1984_s27 }
 0x6d0   : > { %864 = vrot.lane.b32.xlu0 %v854_v16, %s1984_s27 }
 0x6d2   : > { %862 = vrot.lane.b32.xlu1 %v853_v17, %s1984_s27 }
 0x6d4   : > { %860 = vrot.lane.b32.xlu0 %v852_v18, %s1984_s27 }
 0x6d6   : > { %969 = vperm.xlu1 %1968, %v931_v19  }
 0x6d8   : > { %964 = vperm.xlu0 %1967, %v930_v21  }
 0x6da   : > { %959 = vperm.xlu1 %1968, %v929_v22  }
 0x6dc   : > { %954 = vperm.xlu0 %1967, %v928_v24  }
 0x6de   : > { %949 = vperm.xlu1 %1968, %v927_v25  }
 0x6e0   : > { %944 = vperm.xlu0 %1967, %v926_v26  }
 0x6e2   : > { %939 = vperm.xlu1 %1968, %v925_v27  }
 0x6e4   : > { %934 = vperm.xlu0 %1967, %v924_v28  }
 0x738   : > { %v895_v29 = vpop.permute.xlu1 %894 }
 0x739   : > { %903 = vst.msk [vmem:[#allocation2 + $0x58] sm:$0xff] %vm458_vm0, %v895_v29 }
 0x73a   : > { %v893_v30 = vpop.permute.xlu0 %892 }
 0x73b   : > { %902 = vst.msk [vmem:[#allocation2 + $0x50] sm:$0xff] %vm458_vm0, %v893_v30 }
 0x73c   : > { %v891_v31 = vpop.permute.xlu1 %890 }
 0x73d   : > { %901 = vst.msk [vmem:[#allocation2 + $0x48] sm:$0xff] %vm458_vm0, %v891_v31 }
 0x73e   : > { %v889_v32 = vpop.permute.xlu0 %888 }
 0x73f   : > { %900 = vst.msk [vmem:[#allocation2 + $0x40] sm:$0xff] %vm458_vm0, %v889_v32 }
 0x740   : > { %v867_v33 = vpop.permute.xlu1 %866  ;;  %v923_v34 = vld [vmem:[#allocation2 + $0x58] sm:$0xff] }
 0x741   : > { %875 = vst.msk [vmem:[#allocation2 + $0x18] sm:$0xff] %vm458_vm0, %v867_v33  ;;  %1876 = vmatprep.subr.mxu0 %v923_v34 }
 0x742   : > { %1877 = vmatpush3.msra.mxu0 %v923_v34  ;;  %v865_v35 = vpop.permute.xlu0 %864  ;;  %v922_v36 = vld [vmem:[#allocation2 + $0x50] sm:$0xff] }
 0x743   : > { %874 = vst.msk [vmem:[#allocation2 + $0x10] sm:$0xff] %vm458_vm0, %v865_v35  ;;  %1878 = vmatprep.subr.mxu0 %v922_v36 }
 0x744   : > { %v863_v37 = vpop.permute.xlu1 %862  ;;  %1879 = vmatpush3.msra.mxu0 %v922_v36  ;;  %v921_v38 = vld [vmem:[#allocation2 + $0x48] sm:$0xff] }
 0x745   : > { %873 = vst.msk [vmem:[#allocation2 + $0x8] sm:$0xff] %vm458_vm0, %v863_v37  ;;  %1880 = vmatprep.subr.mxu0 %v921_v38 }
 0x746   : > { %1881 = vmatpush3.msra.mxu0 %v921_v38  ;;  %v861_v39 = vpop.permute.xlu0 %860  ;;  %v920_v40 = vld [vmem:[#allocation2 + $0x40] sm:$0xff] }
 0x747   : > { %872 = vst.msk [vmem:[#allocation2] sm:$0xff] %vm458_vm0, %v861_v39  ;;  %1882 = vmatprep.subr.mxu0 %v920_v40 }
 0x748   : > { %1883 = vmatpush3.msra.mxu0 %v920_v40  ;;  %v915_v45 = vld [vmem:[#allocation2 + $0x18] sm:$0xff] }
 0x749   : > { %1884 = vmatprep.subr.mxu0 %v919_v41 }
 0x74a   : > { %1885 = vmatpush3.msra.mxu0 %v919_v41  ;;  %v914_v46 = vld [vmem:[#allocation2 + $0x10] sm:$0xff] }
 0x74b   : > { %1886 = vmatprep.subr.mxu0 %v918_v42 }
 0x74c   : > { %1887 = vmatpush3.msra.mxu0 %v918_v42  ;;  %v913_v47 = vld [vmem:[#allocation2 + $0x8] sm:$0xff] }
 0x74d   : > { %1888 = vmatprep.subr.mxu0 %v917_v43 }
 0x74e   : > { %1889 = vmatpush3.msra.mxu0 %v917_v43  ;;  %v912_v48 = vld [vmem:[#allocation2] sm:$0xff] }
 0x74f   : > { %1890 = vmatprep.subr.mxu0 %v916_v44 }
 0x750   : > { %1891 = vmatpush3.msra.mxu0 %v916_v44 }
 0x751   : > { %1892 = vmatprep.subr.mxu0 %v915_v45  ;;  %v970_v57 = vpop.permute.xlu1 %969 }
 0x752   : > { %1893 = vmatpush3.msra.mxu0 %v915_v45 }
 0x753   : > { %1894 = vmatprep.subr.mxu0 %v914_v46  ;;  %v965_v58 = vpop.permute.xlu0 %964 }
 0x754   : > { %1895 = vmatpush3.msra.mxu0 %v914_v46 }
 0x755   : > { %1896 = vmatprep.subr.mxu0 %v913_v47  ;;  %v960_v59 = vpop.permute.xlu1 %959 }
 0x756   : > { %1897 = vmatpush3.msra.mxu0 %v913_v47 }
 0x757   : > { %1898 = vmatprep.subr.mxu0 %v912_v48  ;;  %v955_v60 = vpop.permute.xlu0 %954 }
 0x758   : > { %1899 = vmatpush3.msra.mxu0 %v912_v48 }
 0x759   : > { %1901 = vmatmul.mubr.msk.f32.vlgmr.msra.gmra.mxu0 %vm972_vm4, %v905_v49  ;;  %v950_v61 = vpop.permute.xlu1 %949 }
 0x75a   : > { %1903 = vmatprep.mubr.msk.f32.mxu0 %vm972_vm4, %v906_v50 }
 0x75b   : > { %v945_v62 = vpop.permute.xlu0 %944 }
 0x75d   : > { %1904 = vmatmul.mubr.msk.f32.gmra.mxu0 %vm972_vm4, %v907_v51  ;;  %v940_v63 = vpop.permute.xlu1 %939 }
 0x75e   : > { %1906 = vmatprep.mubr.msk.f32.mxu0 %vm972_vm4, %v908_v52 }
 0x75f   : > { %v935_v2 = vpop.permute.xlu0 %934 }
 0x761   : > { %1907 = vmatmul.mubr.msk.f32.gmra.mxu0 %vm972_vm4, %v909_v53 }
 0x762   : > { %1909 = vmatprep.mubr.msk.f32.mxu0 %vm972_vm4, %v910_v54 }
 0x765   : > { %1910 = vmatmul.mubr.msk.f32.gmra.mxu0 %vm972_vm4, %v911_v55 }
 0x819   : > { %v1902_v0 = vpop.f32.mrf.mxu0 }
 0x81a   : > { %v1069_v1 = vadd.f32 %v1902_v0, %v940_v63 }
 0x81b   : > { %v1063_v3 = vpop.f32.mrf.mxu0 }
 0x81c   : > { %v2286_v4 = vmax.f32 %v1069_v1, 0.0  ;;  %v1064_v5 = vadd.f32 %v1063_v3, %v935_v2 }
 0x81d   : > { %v1905_v6 = vpop.f32.mrf.mxu0 }
 0x81e   : > { %1207 = vst.msk [vmem:[#allocation2 + $0x48] sm:$0xff] %vm458_vm0, %v2286_v4  ;;  %v2290_v7 = vmax.f32 %v1064_v5, 0.0  ;;  %v1079_v8 = vadd.f32 %v1905_v6, %v950_v61 }
 0x81f   : > { %v1073_v9 = vpop.f32.mrf.mxu0 }
 0x820   : > { %1206 = vst.msk [vmem:[#allocation2 + $0x40] sm:$0xff] %vm458_vm0, %v2290_v7  ;;  %v2294_v10 = vmax.f32 %v1079_v8, 0.0  ;;  %v1074_v11 = vadd.f32 %v1073_v9, %v945_v62 }
 0x821   : > { %v1908_v12 = vpop.f32.mrf.mxu0 }
 0x822   : > { %1209 = vst.msk [vmem:[#allocation2 + $0x58] sm:$0xff] %vm458_vm0, %v2294_v10  ;;  %v2298_v13 = vmax.f32 %v1074_v11, 0.0  ;;  %v1089_v15 = vadd.f32 %v1908_v12, %v960_v59 }
 0x823   : > { %v1083_v16 = vpop.f32.mrf.mxu0 }
 0x824   : > { %1208 = vst.msk [vmem:[#allocation2 + $0x50] sm:$0xff] %vm458_vm0, %v2298_v13  ;;  %v2302_v17 = vmax.f32 %v1089_v15, 0.0  ;;  %v1084_v18 = vadd.f32 %v1083_v16, %v955_v60 }
 0x825   : > { %v1911_v19 = vpop.f32.mrf.mxu0  ;;  %v1287_v33 = vld [vmem:[#allocation2 + $0x48] sm:$0xff] }
 0x826   : > { %1211 = vst.msk [vmem:[#allocation2 + $0x68] sm:$0xff] %vm458_vm0, %v2302_v17  ;;  %v2306_v21 = vmax.f32 %v1084_v18, 0.0  ;;  %v1099_v22 = vadd.f32 %v1911_v19, %v970_v57  ;;  %v1263_v18 = vld [vmem:[%s2569_s7 + $0x8] sm:$0xff] }
 0x827   : > { %v1093_v23 = vpop.f32.mrf.mxu0  ;;  %v1286_v34 = vld [vmem:[#allocation2 + $0x40] sm:$0xff]  ;;  %1770 = vmatprep.mubr.msk.f32.mxu1 %vm1350_vm5, %v1263_v18 }
 0x828   : > { %1210 = vst.msk [vmem:[#allocation2 + $0x60] sm:$0xff] %vm458_vm0, %v2306_v21  ;;  %v2310_v24 = vmax.f32 %v1099_v22, 0.0  ;;  %v1094_v25 = vadd.f32 %v1093_v23, %v965_v58  ;;  %v1302_v22 = vld [vmem:[%s2570_s8] sm:$0xff]  ;;  %v1303_v23 = vld [vmem:[%s2570_s8 + $0x8] sm:$0xff] }
 0x829   : > { %v1289_v31 = vld [vmem:[#allocation2 + $0x58] sm:$0xff] }
 0x82a   : > { %1213 = vst.msk [vmem:[#allocation2 + $0x78] sm:$0xff] %vm458_vm0, %v2310_v24  ;;  %v2314_v26 = vmax.f32 %v1094_v25, 0.0  ;;  %1131 = vrot.lane.b32.xlu1 %v2310_v24, %s1977_s16  ;;  %v1306_v25 = vld [vmem:[%s2570_s8 + $0x20] sm:$0xff] }
 0x82b   : > { %v1288_v32 = vld [vmem:[#allocation2 + $0x50] sm:$0xff] }
 0x82c   : > { %1212 = vst.msk [vmem:[#allocation2 + $0x70] sm:$0xff] %vm458_vm0, %v2314_v26  ;;  %1128 = vrot.lane.b32.xlu0 %v2314_v26, %s1977_s16 }
 0x82d   : > { %v1291_v29 = vld [vmem:[#allocation2 + $0x68] sm:$0xff] }
 0x82e   : > { %1125 = vrot.lane.b32.xlu1 %v2302_v17, %s1977_s16 }
 0x82f   : > { %v1290_v30 = vld [vmem:[#allocation2 + $0x60] sm:$0xff] }
 0x830   : > { %1122 = vrot.lane.b32.xlu0 %v2306_v21, %s1977_s16 }
 0x831   : > { %v1293_v27 = vld [vmem:[#allocation2 + $0x78] sm:$0xff] }
 0x832   : > { %1119 = vrot.lane.b32.xlu1 %v2294_v10, %s1977_s16  ;;  %1376 = vmatpush1.msra.mxu1 %v1293_v27  ;;  %v1308_v27 = vld [vmem:[%s2570_s8 + $0x30] sm:$0xff] }
 0x833   : > { %1377 = vmatprep.subr.mxu1 %v1987_v56  ;;  %v1292_v28 = vld [vmem:[#allocation2 + $0x70] sm:$0xff] }
 0x834   : > { %1378 = vmatpush1.msra.mxu1 %v1292_v28  ;;  %1116 = vrot.lane.b32.xlu0 %v2298_v13, %s1977_s16  ;;  %v1309_v28 = vld [vmem:[%s2570_s8 + $0x38] sm:$0xff] }
 0x835   : > { %1379 = vmatprep.subr.mxu1 %v1987_v56 }
 0x836   : > { %1113 = vrot.lane.b32.xlu1 %v2286_v4, %s1977_s16  ;;  %1380 = vmatpush1.msra.mxu1 %v1291_v29 }
 0x837   : > { %1381 = vmatprep.subr.mxu1 %v1987_v56 }
 0x838   : > { %1382 = vmatpush1.msra.mxu1 %v1290_v30  ;;  %1110 = vrot.lane.b32.xlu0 %v2290_v7, %s1977_s16 }
 0x839   : > { %1383 = vmatprep.subr.mxu1 %v1987_v56 }
 0x83a   : > { %1384 = vmatpush1.msra.mxu1 %v1289_v31 }
 0x83b   : > { %1385 = vmatprep.subr.mxu1 %v1987_v56 }
 0x83c   : > { %1386 = vmatpush1.msra.mxu1 %v1288_v32 }
 0x83d   : > { %1387 = vmatprep.subr.mxu1 %v1987_v56 }
 0x83e   : > { %1388 = vmatpush1.msra.mxu1 %v1287_v33 }
 0x83f   : > { %1389 = vmatprep.subr.mxu1 %v1987_v56 }
 0x840   : > { %1390 = vmatpush1.msra.mxu1 %v1286_v34 }
 0x841   : > { %1391 = vmatprep.subr.mxu1 %v1987_v56 }
 0x89c   : > { %v1132_v35 = vpop.permute.xlu1 %1131 }
 0x89d   : > { %v1133_v36 = vsel %vm438_vm1, %v1132_v35, %v2310_v24 }
 0x89e   : > { %1148 = vrot.lane.b32.xlu1 %v1133_v36, %s1977_s16  ;;  %v1129_v37 = vpop.permute.xlu0 %1128 }
 0x89f   : > { %v1130_v38 = vsel %vm438_vm1, %v1129_v37, %v2314_v26 }
 0x8a0   : > { %v1126_v39 = vpop.permute.xlu1 %1125  ;;  %1146 = vrot.lane.b32.xlu0 %v1130_v38, %s1977_s16 }
 0x8a1   : > { %v1127_v40 = vsel %vm438_vm1, %v1126_v39, %v2302_v17 }
 0x8a2   : > { %1144 = vrot.lane.b32.xlu1 %v1127_v40, %s1977_s16  ;;  %v1123_v41 = vpop.permute.xlu0 %1122 }
 0x8a3   : > { %v1124_v42 = vsel %vm438_vm1, %v1123_v41, %v2306_v21 }
 0x8a4   : > { %v1120_v43 = vpop.permute.xlu1 %1119  ;;  %1142 = vrot.lane.b32.xlu0 %v1124_v42, %s1977_s16 }
 0x8a5   : > { %v1121_v44 = vsel %vm438_vm1, %v1120_v43, %v2294_v10 }
 0x8a6   : > { %1140 = vrot.lane.b32.xlu1 %v1121_v44, %s1977_s16  ;;  %v1117_v45 = vpop.permute.xlu0 %1116 }
 0x8a7   : > { %v1118_v46 = vsel %vm438_vm1, %v1117_v45, %v2298_v13 }
 0x8a8   : > { %v1114_v47 = vpop.permute.xlu1 %1113  ;;  %1138 = vrot.lane.b32.xlu0 %v1118_v46, %s1977_s16 }
 0x8a9   : > { %v1115_v48 = vsel %vm438_vm1, %v1114_v47, %v2286_v4 }
 0x8aa   : > { %1136 = vrot.lane.b32.xlu1 %v1115_v48, %s1977_s16  ;;  %v1111_v49 = vpop.permute.xlu0 %1110 }
 0x8ab   : > { %v1112_v50 = vsel %vm438_vm1, %v1111_v49, %v2290_v7 }
 0x8ac   : > { %1134 = vrot.lane.b32.xlu0 %v1112_v50, %s1977_s16 }
 0x910   : > { %v1149_v51 = vpop.permute.xlu1 %1148 }
 0x911   : > { %v1157_v52 = vsel %vm438_vm1, %v1149_v51, %v2310_v24  ;;  %v1304_v24 = vld [vmem:[%s2570_s8 + $0x10] sm:$0xff] }
 0x912   : > { %v1165_v53 = vmul.f32 %v1157_v52, %v2087_v20  ;;  %v1147_v54 = vpop.permute.xlu0 %1146 }
 0x913   : > { %v1156_v55 = vsel %vm438_vm1, %v1147_v54, %v2314_v26  ;;  %v1307_v26 = vld [vmem:[%s2570_s8 + $0x28] sm:$0xff] }
 0x914   : > { %v1164_v57 = vmul.f32 %v1156_v55, %v2087_v20  ;;  %1188 = vrot.lane.b32.xlu1 %v1165_v53, %s1984_s27  ;;  %v1145_v58 = vpop.permute.xlu1 %1144  ;;  %v1220_v16 = vmul.f32 %v1156_v55, %v2080_v14 }
 0x915   : > { %v1155_v59 = vsel %vm438_vm1, %v1145_v58, %v2302_v17 }
 0x916   : > { %v1163_v60 = vmul.f32 %v1155_v59, %v2087_v20  ;;  %1186 = vrot.lane.b32.xlu0 %v1164_v57, %s1984_s27  ;;  %v1143_v61 = vpop.permute.xlu0 %1142 }
 0x917   : > { %v1154_v62 = vsel %vm438_vm1, %v1143_v61, %v2306_v21  ;;  %v1262_v61 = vld [vmem:[%s2569_s7] sm:$0xff] }
 0x918   : > { %v1162_v63 = vmul.f32 %v1154_v62, %v2087_v20  ;;  %1184 = vrot.lane.b32.xlu1 %v1163_v60, %s1984_s27  ;;  %v1141_v0 = vpop.permute.xlu1 %1140  ;;  %v1218_v17 = vmul.f32 %v1154_v62, %v2080_v14 }
 0x919   : > { %v1153_v1 = vsel %vm438_vm1, %v1141_v0, %v2294_v10  ;;  %v1264_v0 = vld [vmem:[%s2569_s7 + $0x10] sm:$0xff] }
 0x91a   : > { %v1161_v2 = vmul.f32 %v1153_v1, %v2087_v20  ;;  %1182 = vrot.lane.b32.xlu0 %v1162_v63, %s1984_s27  ;;  %v1139_v3 = vpop.permute.xlu0 %1138  ;;  %v1265_v63 = vld [vmem:[%s2569_s7 + $0x18] sm:$0xff] }
 0x91b   : > { %v1152_v5 = vsel %vm438_vm1, %v1139_v3, %v2298_v13  ;;  %v1221_v13 = vmul.f32 %v1157_v52, %v2080_v14  ;;  %v1269_v3 = vld [vmem:[%s2569_s7 + $0x38] sm:$0xff] }
 0x91c   : > { %v1160_v6 = vmul.f32 %v1152_v5, %v2087_v20  ;;  %1180 = vrot.lane.b32.xlu1 %v1161_v2, %s1984_s27  ;;  %v1137_v8 = vpop.permute.xlu1 %1136  ;;  %v1266_v2 = vld [vmem:[%s2569_s7 + $0x20] sm:$0xff] }
 0x91d   : > { %v1151_v9 = vsel %vm438_vm1, %v1137_v8, %v2286_v4  ;;  %v1219_v4 = vmul.f32 %v1155_v59, %v2080_v14  ;;  %v1270_v8 = vld [vmem:[%s2569_s7 + $0x40] sm:$0xff] }
 0x91e   : > { %v1159_v11 = vmul.f32 %v1151_v9, %v2087_v20  ;;  %1178 = vrot.lane.b32.xlu0 %v1160_v6, %s1984_s27  ;;  %v1135_v10 = vpop.permute.xlu0 %1134  ;;  %v1215_v19 = vmul.f32 %v1151_v9, %v2080_v14  ;;  %v1271_v6 = vld [vmem:[%s2569_s7 + $0x48] sm:$0xff]  ;;  %v1273_v9 = vld [vmem:[%s2569_s7 + $0x58] sm:$0xff] }
 0x91f   : > { %v1150_v12 = vsel %vm438_vm1, %v1135_v10, %v2290_v7  ;;  %v1216_v7 = vmul.f32 %v1152_v5, %v2080_v14  ;;  %v1268_v5 = vld [vmem:[%s2569_s7 + $0x30] sm:$0xff]  ;;  %v1275_v10 = vld [vmem:[%s2569_s7 + $0x68] sm:$0xff] }
 0x920   : > { %v1158_v15 = vmul.f32 %v1150_v12, %v2087_v20  ;;  %1176 = vrot.lane.b32.xlu1 %v1159_v11, %s1984_s27  ;;  %v1217_v20 = vmul.f32 %v1153_v1, %v2080_v14  ;;  %v1214_v21 = vmul.f32 %v1150_v12, %v2080_v14  ;;  %v1305_v14 = vld [vmem:[%s2570_s8 + $0x18] sm:$0xff]  ;;  %v1267_v1 = vld [vmem:[%s2569_s7 + $0x28] sm:$0xff]  ;;  %v1272_v11 = vld [vmem:[%s2569_s7 + $0x50] sm:$0xff] }
 0x921   : > { %v1274_v12 = vld [vmem:[%s2569_s7 + $0x60] sm:$0xff] }
 0x922   : > { %1174 = vrot.lane.b32.xlu0 %v1158_v15, %s1984_s27  ;;  %v1277_v15 = vld [vmem:[%s2569_s7 + $0x78] sm:$0xff] }
 0x924   : > { %1244 = vrot.lane.b32.xlu1 %v1221_v13, %s1982_s21  ;;  %v1276_v13 = vld [vmem:[%s2569_s7 + $0x70] sm:$0xff] }
 0x926   : > { %1242 = vrot.lane.b32.xlu0 %v1220_v16, %s1982_s21  ;;  %v1489_v16 = vld [vmem:[%s2574_s12 + $0x8] sm:$0xff] }
 0x927   : > { %1912 = vmatprep.subr.mxu0 %v1489_v16 }
 0x928   : > { %1240 = vrot.lane.b32.xlu1 %v1219_v4, %s1982_s21  ;;  %1913 = vmatpush3.msra.mxu0 %v1489_v16  ;;  %v1488_v4 = vld [vmem:[%s2574_s12] sm:$0xff] }
 0x929   : > { %1914 = vmatprep.subr.mxu0 %v1488_v4 }
 0x92a   : > { %1238 = vrot.lane.b32.xlu0 %v1218_v17, %s1982_s21  ;;  %1915 = vmatpush3.msra.mxu0 %v1488_v4 }
 0x92b   : > { %1928 = vmatprep.subr.mxu0 %v1987_v56 }
 0x92c   : > { %1236 = vrot.lane.b32.xlu1 %v1217_v20, %s1982_s21 }
 0x92e   : > { %1234 = vrot.lane.b32.xlu0 %v1216_v7, %s1982_s21 }
 0x930   : > { %1232 = vrot.lane.b32.xlu1 %v1215_v19, %s1982_s21 }
 0x932   : > { %1230 = vrot.lane.b32.xlu0 %v1214_v21, %s1982_s21 }
 0x934   : > { %1312 = vperm.xlu1 %1968, %v1302_v22  }
 0x936   : > { %1317 = vperm.xlu0 %1967, %v1303_v23  }
 0x938   : > { %1322 = vperm.xlu1 %1968, %v1304_v24  }
 0x93a   : > { %1327 = vperm.xlu0 %1967, %v1305_v14  }
 0x93c   : > { %1332 = vperm.xlu1 %1968, %v1306_v25  }
 0x93e   : > { %1337 = vperm.xlu0 %1967, %v1307_v26  }
 0x940   : > { %1342 = vperm.xlu1 %1968, %v1308_v27  }
 0x942   : > { %1347 = vperm.xlu0 %1967, %v1309_v28  }
 0x986   : > { %v1189_v29 = vpop.permute.xlu1 %1188 }
 0x987   : > { %1205 = vst.msk [vmem:[#allocation2 + $0x38] sm:$0xff] %vm458_vm0, %v1189_v29 }
 0x988   : > { %v1187_v30 = vpop.permute.xlu0 %1186 }
 0x989   : > { %1204 = vst.msk [vmem:[#allocation2 + $0x30] sm:$0xff] %vm458_vm0, %v1187_v30 }
 0x98a   : > { %v1185_v31 = vpop.permute.xlu1 %1184 }
 0x98b   : > { %1203 = vst.msk [vmem:[#allocation2 + $0x28] sm:$0xff] %vm458_vm0, %v1185_v31 }
 0x98c   : > { %v1183_v32 = vpop.permute.xlu0 %1182 }
 0x98d   : > { %1202 = vst.msk [vmem:[#allocation2 + $0x20] sm:$0xff] %vm458_vm0, %v1183_v32 }
 0x98e   : > { %v1181_v33 = vpop.permute.xlu1 %1180  ;;  %v1285_v34 = vld [vmem:[#allocation2 + $0x38] sm:$0xff] }
 0x98f   : > { %1201 = vst.msk [vmem:[#allocation2 + $0x18] sm:$0xff] %vm458_vm0, %v1181_v33  ;;  %1392 = vmatpush1.msra.mxu1 %v1285_v34 }
 0x990   : > { %1393 = vmatprep.subr.mxu1 %v1987_v56  ;;  %v1179_v35 = vpop.permute.xlu0 %1178  ;;  %v1284_v36 = vld [vmem:[#allocation2 + $0x30] sm:$0xff] }
 0x991   : > { %1200 = vst.msk [vmem:[#allocation2 + $0x10] sm:$0xff] %vm458_vm0, %v1179_v35  ;;  %1394 = vmatpush1.msra.mxu1 %v1284_v36 }
 0x992   : > { %v1177_v37 = vpop.permute.xlu1 %1176  ;;  %1395 = vmatprep.subr.mxu1 %v1987_v56  ;;  %v1283_v38 = vld [vmem:[#allocation2 + $0x28] sm:$0xff] }
 0x993   : > { %1199 = vst.msk [vmem:[#allocation2 + $0x8] sm:$0xff] %vm458_vm0, %v1177_v37  ;;  %1396 = vmatpush1.msra.mxu1 %v1283_v38 }
 0x994   : > { %1397 = vmatprep.subr.mxu1 %v1987_v56  ;;  %v1175_v39 = vpop.permute.xlu0 %1174  ;;  %v1282_v40 = vld [vmem:[#allocation2 + $0x20] sm:$0xff] }
 0x995   : > { %1198 = vst.msk [vmem:[#allocation2] sm:$0xff] %vm458_vm0, %v1175_v39  ;;  %1398 = vmatpush1.msra.mxu1 %v1282_v40 }
 0x996   : > { %v1245_v41 = vpop.permute.xlu1 %1244  ;;  %1399 = vmatprep.subr.mxu1 %v1987_v56  ;;  %v1281_v42 = vld [vmem:[#allocation2 + $0x18] sm:$0xff] }
 0x997   : > { %1261 = vst.msk [vmem:[#allocation2 + $0xb8] sm:$0xff] %vm458_vm0, %v1245_v41  ;;  %1400 = vmatpush1.msra.mxu1 %v1281_v42 }
 0x998   : > { %1401 = vmatprep.subr.mxu1 %v1987_v56  ;;  %v1243_v43 = vpop.permute.xlu0 %1242  ;;  %v1280_v44 = vld [vmem:[#allocation2 + $0x10] sm:$0xff] }
 0x999   : > { %1260 = vst.msk [vmem:[#allocation2 + $0xb0] sm:$0xff] %vm458_vm0, %v1243_v43  ;;  %1402 = vmatpush1.msra.mxu1 %v1280_v44 }
 0x99a   : > { %v1241_v45 = vpop.permute.xlu1 %1240  ;;  %1403 = vmatprep.subr.mxu1 %v1987_v56  ;;  %v1279_v46 = vld [vmem:[#allocation2 + $0x8] sm:$0xff] }
 0x99b   : > { %1259 = vst.msk [vmem:[#allocation2 + $0xa8] sm:$0xff] %vm458_vm0, %v1241_v45  ;;  %1404 = vmatpush1.msra.mxu1 %v1279_v46 }
 0x99c   : > { %1405 = vmatprep.subr.mxu1 %v1987_v56  ;;  %v1239_v47 = vpop.permute.xlu0 %1238  ;;  %v1278_v48 = vld [vmem:[#allocation2] sm:$0xff] }
 0x99d   : > { %1258 = vst.msk [vmem:[#allocation2 + $0xa0] sm:$0xff] %vm458_vm0, %v1239_v47  ;;  %1406 = vmatpush1.msra.mxu1 %v1278_v48 }
 0x99e   : > { %v1237_v49 = vpop.permute.xlu1 %1236  ;;  %1423 = vmatprep.subr.mxu1 %v1987_v56  ;;  %v1301_v50 = vld [vmem:[#allocation2 + $0xb8] sm:$0xff] }
 0x99f   : > { %1257 = vst.msk [vmem:[#allocation2 + $0x98] sm:$0xff] %vm458_vm0, %v1237_v49  ;;  %1424 = vmatpush2.msra.mxu1 %v1301_v50 }
 0x9a0   : > { %1425 = vmatprep.subr.mxu1 %v1987_v56  ;;  %v1235_v51 = vpop.permute.xlu0 %1234  ;;  %v1300_v52 = vld [vmem:[#allocation2 + $0xb0] sm:$0xff] }
 0x9a1   : > { %1256 = vst.msk [vmem:[#allocation2 + $0x90] sm:$0xff] %vm458_vm0, %v1235_v51  ;;  %1426 = vmatpush2.msra.mxu1 %v1300_v52 }
 0x9a2   : > { %v1233_v53 = vpop.permute.xlu1 %1232  ;;  %1427 = vmatprep.subr.mxu1 %v1987_v56  ;;  %v1299_v54 = vld [vmem:[#allocation2 + $0xa8] sm:$0xff] }
 0x9a3   : > { %1255 = vst.msk [vmem:[#allocation2 + $0x88] sm:$0xff] %vm458_vm0, %v1233_v53  ;;  %1428 = vmatpush2.msra.mxu1 %v1299_v54 }
 0x9a4   : > { %1429 = vmatprep.subr.mxu1 %v1987_v56  ;;  %v1231_v55 = vpop.permute.xlu0 %1230  ;;  %v1298_v57 = vld [vmem:[#allocation2 + $0xa0] sm:$0xff] }
 0x9a5   : > { %1254 = vst.msk [vmem:[#allocation2 + $0x80] sm:$0xff] %vm458_vm0, %v1231_v55  ;;  %1430 = vmatpush2.msra.mxu1 %v1298_v57 }
 0x9a6   : > { %1431 = vmatprep.subr.mxu1 %v1987_v56  ;;  %v1297_v58 = vld [vmem:[#allocation2 + $0x98] sm:$0xff] }
 0x9a7   : > { %1432 = vmatpush2.msra.mxu1 %v1297_v58 }
 0x9a8   : > { %1433 = vmatprep.subr.mxu1 %v1987_v56  ;;  %v1296_v59 = vld [vmem:[#allocation2 + $0x90] sm:$0xff] }
 0x9a9   : > { %1434 = vmatpush2.msra.mxu1 %v1296_v59 }
 0x9aa   : > { %1435 = vmatprep.subr.mxu1 %v1987_v56  ;;  %v1295_v60 = vld [vmem:[#allocation2 + $0x88] sm:$0xff] }
 0x9ab   : > { %1436 = vmatpush2.msra.mxu1 %v1295_v60 }
 0x9ac   : > { %1437 = vmatprep.subr.mxu1 %v1987_v56  ;;  %v1294_v62 = vld [vmem:[#allocation2 + $0x80] sm:$0xff] }
 0x9ad   : > { %1438 = vmatpush2.msra.mxu1 %v1294_v62 }
 0x9ae   : > { %1440 = vmatmul.mubr.f32.vlgmr.msra.gmra.mxu1 %v1262_v61 }
 0x9af   : > { %1771 = vmatprep.mubr.msk.f32.mxu1 %vm1350_vm5, %v1265_v63  ;;  %v1313_v17 = vpop.permute.xlu1 %1312 }
 0x9b1   : > { %v1318_v21 = vpop.permute.xlu0 %1317 }
 0x9b2   : > { %1445 = vmatmul.mubr.f32.gmra.mxu1 %v1264_v0  ;;  %v1619_v0 = vld [vmem:[%s2571_s9] sm:$0x3] }
 0x9b3   : > { %1772 = vmatprep.mubr.msk.f32.mxu1 %vm1350_vm5, %v1267_v1  ;;  %v1323_v25 = vpop.permute.xlu1 %1322  ;;  %v1620_v1 = vld [vmem:[%s2572_s10] sm:$0x3] }
 0x9b5   : > { %v1328_v30 = vpop.permute.xlu0 %1327 }
 0x9b6   : > { %1450 = vmatmul.mubr.f32.gmra.mxu1 %v1266_v2 }
 0x9b7   : > { %1773 = vmatprep.mubr.msk.f32.mxu1 %vm1350_vm5, %v1269_v3  ;;  %v1333_v35 = vpop.permute.xlu1 %1332 }
 0x9b9   : > { %v1338_v40 = vpop.permute.xlu0 %1337 }
 0x9ba   : > { %1455 = vmatmul.mubr.f32.gmra.mxu1 %v1268_v5 }
 0x9bb   : > { %1774 = vmatprep.mubr.msk.f32.mxu1 %vm1350_vm5, %v1271_v6  ;;  %v1343_v45 = vpop.permute.xlu1 %1342 }
 0x9bd   : > { %v1348_v50 = vpop.permute.xlu0 %1347 }
 0x9be   : > { %1460 = vmatmul.mubr.f32.gmra.mxu1 %v1270_v8 }
 0x9bf   : > { %1775 = vmatprep.mubr.msk.f32.mxu1 %vm1350_vm5, %v1273_v9 }
 0x9c2   : > { %1465 = vmatmul.mubr.f32.gmra.mxu1 %v1272_v11 }
 0x9c3   : > { %1776 = vmatprep.mubr.msk.f32.mxu1 %vm1350_vm5, %v1275_v10 }
 0x9c6   : > { %1470 = vmatmul.mubr.f32.gmra.mxu1 %v1274_v12 }
 0x9c7   : > { %1777 = vmatprep.mubr.msk.f32.mxu1 %vm1350_vm5, %v1277_v15 }
 0x9ca   : > { %1475 = vmatmul.mubr.f32.gmra.mxu1 %v1276_v13 }
 0xa6e   : > { %v1441_v20 = vpop.f32.mrf.mxu1 }
 0xa6f   : > { %v1442_v7 = vadd.f32 %v1441_v20, %v1313_v17 }
 0xa70   : > { %v1443_v18 = vpop.f32.mrf.mxu1 }
 0xa71   : > { %v1480_v19 = vmax.f32 %v1442_v7, 0.0 }
 0xa72   : > { %v1446_v22 = vpop.f32.mrf.mxu1 }
 0xa73   : > { %v1447_v23 = vadd.f32 %v1446_v22, %v1318_v21  ;;  %1916 = vmatprep.mubr.msk.f32.mxu0 %vm458_vm0, %v1480_v19 }
 0xa74   : > { %v1448_v24 = vpop.f32.mrf.mxu1 }
 0xa75   : > { %v1481_v14 = vmax.f32 %v1447_v23, 0.0 }
 0xa76   : > { %v1451_v26 = vpop.f32.mrf.mxu1 }
 0xa77   : > { %v1452_v27 = vadd.f32 %v1451_v26, %v1323_v25  ;;  %1917 = vmatmul.mubr.msk.f32.vlgmr.msra.gmra.mxu0 %vm458_vm0, %v1481_v14 }
 0xa78   : > { %v1453_v28 = vpop.f32.mrf.mxu1 }
 0xa79   : > { %v1482_v29 = vmax.f32 %v1452_v27, 0.0 }
 0xa7a   : > { %v1456_v31 = vpop.f32.mrf.mxu1 }
 0xa7b   : > { %v1457_v32 = vadd.f32 %v1456_v31, %v1328_v30  ;;  %1919 = vmatprep.mubr.msk.f32.mxu0 %vm458_vm0, %v1482_v29 }
 0xa7c   : > { %v1458_v33 = vpop.f32.mrf.mxu1 }
 0xa7d   : > { %v1483_v34 = vmax.f32 %v1457_v32, 0.0 }
 0xa7e   : > { %v1461_v36 = vpop.f32.mrf.mxu1 }
 0xa7f   : > { %v1462_v37 = vadd.f32 %v1461_v36, %v1333_v35  ;;  %1920 = vmatmul.mubr.msk.f32.gmra.mxu0 %vm458_vm0, %v1483_v34 }
 0xa80   : > { %v1463_v38 = vpop.f32.mrf.mxu1 }
 0xa81   : > { %v1484_v39 = vmax.f32 %v1462_v37, 0.0 }
 0xa82   : > { %v1466_v41 = vpop.f32.mrf.mxu1 }
 0xa83   : > { %v1467_v42 = vadd.f32 %v1466_v41, %v1338_v40  ;;  %1922 = vmatprep.mubr.msk.f32.mxu0 %vm458_vm0, %v1484_v39 }
 0xa84   : > { %v1468_v43 = vpop.f32.mrf.mxu1 }
 0xa85   : > { %v1485_v44 = vmax.f32 %v1467_v42, 0.0 }
 0xa86   : > { %v1471_v46 = vpop.f32.mrf.mxu1 }
 0xa87   : > { %v1472_v47 = vadd.f32 %v1471_v46, %v1343_v45  ;;  %1923 = vmatmul.mubr.msk.f32.gmra.mxu0 %vm458_vm0, %v1485_v44 }
 0xa88   : > { %v1473_v48 = vpop.f32.mrf.mxu1 }
 0xa89   : > { %v1486_v49 = vmax.f32 %v1472_v47, 0.0 }
 0xa8a   : > { %v1476_v51 = vpop.f32.mrf.mxu1 }
 0xa8b   : > { %v1477_v52 = vadd.f32 %v1476_v51, %v1348_v50  ;;  %1925 = vmatprep.mubr.msk.f32.mxu0 %vm458_vm0, %v1486_v49 }
 0xa8c   : > { %v1478_v53 = vpop.f32.mrf.mxu1 }
 0xa8d   : > { %v1487_v54 = vmax.f32 %v1477_v52, 0.0 }
 0xa8f   : > { %1926 = vmatmul.mubr.msk.f32.gmra.mxu0 %vm458_vm0, %v1487_v54 }
 0xa90   : > { %1944 = vmatprep.mubr.msk.f32.mxu0 %vm1988_vm6, %v1987_v56 }
 0xb37   : > { %v1918_v55 = vpop.f32.mrf.mxu0 }
 0xb39   : > { %v1580_v57 = vpop.f32.mrf.mxu0 }
 0xb3f   : > { %v1921_v58 = vpop.f32.mrf.mxu0 }
 0xb41   : > { %v1590_v59 = vpop.f32.mrf.mxu0 }
 0xb47   : > { %v1924_v60 = vpop.f32.mrf.mxu0 }
 0xb49   : > { %v1600_v61 = vpop.f32.mrf.mxu0 }
 0xb4f   : > { %v1927_v62 = vpop.f32.mrf.mxu0 }
 0xb50   : > { %1929 = vmatpush3.msra.mxu0 %v1927_v62 }
 0xb51   : > { %v1610_v63 = vpop.f32.mrf.mxu0  ;;  %1930 = vmatprep.subr.mxu0 %v1987_v56 }
 0xb52   : > { %1931 = vmatpush3.msra.mxu0 %v1610_v63 }
 0xb53   : > { %1932 = vmatprep.subr.mxu0 %v1987_v56 }
 0xb54   : > { %1933 = vmatpush3.msra.mxu0 %v1924_v60 }
 0xb55   : > { %1934 = vmatprep.subr.mxu0 %v1987_v56 }
 0xb56   : > { %1935 = vmatpush3.msra.mxu0 %v1600_v61 }
 0xb57   : > { %1936 = vmatprep.subr.mxu0 %v1987_v56 }
 0xb58   : > { %1937 = vmatpush3.msra.mxu0 %v1921_v58 }
 0xb59   : > { %1938 = vmatprep.subr.mxu0 %v1987_v56 }
 0xb5a   : > { %1939 = vmatpush3.msra.mxu0 %v1590_v59 }
 0xb5b   : > { %1940 = vmatprep.subr.mxu0 %v1987_v56 }
 0xb5c   : > { %1941 = vmatpush3.msra.mxu0 %v1918_v55 }
 0xb5d   : > { %1942 = vmatprep.subr.mxu0 %v1987_v56 }
 0xb5e   : > { %1943 = vmatpush3.msra.mxu0 %v1580_v57 }
 0xb5f   : > { %1945 = vmatmul.mubr.msk.f32.vlgmr.msra.gmra.mxu0 %vm1350_vm5, %v1619_v0 }
 0xc1f   : > { %v1690_v2 = vpop.f32.mrf.mxu0 }
 0xc20   : > { %v1691_v3 = vadd.f32 %v1690_v2, %v1620_v1 }
 0xc21   : > { %v1946_v5 = vpop.f32.mrf.mxu0 }
 0xc22   : > { %1695 = vst.msk [vmem:[%s435_s19] sm:$0x3] %vm1694_vm7, %v1691_v3 }
 0xc23 PF: > { %s23_s25 = sadd.s32 1, %s1975_s25  }
 0xc24   : > { %p20_p4 = scmp.ge.s32.totalorder %s23_s25, 4  }
 0xc26   :  { %22 = sbr.rel (!%p20_p4) target bundleno = 1 (0x1), region = 102 }

</bundles_post_ra>
